<compile_context>
chip_gen: v7x
topology: tpu7x:2x2x1
jax: 0.10.0
libtpu: 0.0.40
codegen_flags: <defaults>
</compile_context>

<pallas_src>
import functools

import jax
import jax.numpy as jnp
from jax.experimental import pallas as pl
from jax.experimental.pallas import tpu as pltpu


def _gru_controller_kernel(persistence_factor,
                           x_ref, pm_ref,
                           wih_ref, whh_ref, bih_ref, bhh_ref,
                           whp_ref, bhp_ref, wmp_ref, bmp_ref,
                           out_ref, hlast_ref, pm_out_ref):
    """One block of BLOCK_B batch rows per program.

    x_ref     : (BB, T, I)   input block
    pm_ref    : (BB, 1, PM)  incoming persistent memory
    wih_ref   : (I, 3H)      fused input weights, gate order [r | z | n]
    whh_ref   : (H, 3H)      fused recurrent weights
    bih_ref   : (1, 3H)      fused input bias
    bhh_ref   : (1, 3H)      fused recurrent bias
    whp_ref   : (H, PM)      hidden_projection.weight.T ; bhp_ref (1, PM)
    wmp_ref   : (PM, H)      memory_projection.weight.T ; bmp_ref (1, H)
    out_ref   : (BB, T, H)   GRU outputs + 0.3 * memory influence
    hlast_ref : (BB, 1, H)   final hidden state
    pm_out_ref: (BB, 1, PM)  updated persistent memory
    """
    BB, T, I = x_ref.shape
    H = out_ref.shape[2]
    H3 = 3 * H

    # ---- fused, hoisted input-side matmul: one MXU push for all gates/steps/rows
    x2 = x_ref[...].reshape(BB * T, I)                                    # (BB*T, I)
    gi = (jnp.dot(x2, wih_ref[...], preferred_element_type=jnp.float32)
          + bih_ref[...]).reshape(BB, T, H3)                              # (BB, T, 3H)

    # ---- recurrent weight / bias loaded & broadcast once, outside the loop
    whh = whh_ref[...]                                                    # (H, 3H)
    bhh = jnp.broadcast_to(bhh_ref[...], (BB, H3))                        # (BB, 3H)

    # ---- fully unrolled recurrence (T small & static); one fused MXU
    #      push/pop per step; h stored straight to out_ref each step so live
    #      vreg count stays O(BB*H) regardless of T.
    h = jnp.zeros((BB, H), jnp.float32)
    for t in range(T):
        gh = jnp.dot(h, whh, preferred_element_type=jnp.float32) + bhh    # (BB, 3H)
        gi_t = gi[:, t, :]                                                # (BB, 3H)
        r = jax.nn.sigmoid(gi_t[:, 0:H] + gh[:, 0:H])
        z = jax.nn.sigmoid(gi_t[:, H:2 * H] + gh[:, H:2 * H])
        n = jnp.tanh(gi_t[:, 2 * H:] + r * gh[:, 2 * H:])
        h = (1.0 - z) * n + z * h
        out_ref[:, pl.ds(t, 1), :] = h[:, None, :]

    # ---- persistent-memory update + influence
    mem_update = jnp.dot(h, whp_ref[...],
                         preferred_element_type=jnp.float32) + bhp_ref[...]       # (BB, PM)
    pm0 = pm_ref[...].reshape(BB, -1)                                              # (BB, PM)
    pm_new = persistence_factor * pm0 + (1.0 - persistence_factor) * mem_update   # (BB, PM)
    influence = jnp.dot(pm_new, wmp_ref[...],
                        preferred_element_type=jnp.float32) + bmp_ref[...]        # (BB, H)

    # Final read-modify-write of the out block + the two small state outputs.
    out_ref[...] = out_ref[...] + 0.3 * influence[:, None, :]
    hlast_ref[...] = h[:, None, :]
    pm_out_ref[...] = pm_new[:, None, :]


def persistent_gru_forward(x, params, *, persistence_factor=0.9,
                           persistent_memory=None):
    """x: (batch, seq, input_size) float32 — PyTorch batch_first convention."""
    B, T, I = x.shape
    H = params["whh"].shape[0]
    PM = params["whp"].shape[1]

    # BLOCK_B batch rows per program: keep >=2 programs for v7x's 2 TCs while
    # folding as many rows as possible into the matmul M dimension.
    if B <= 1:
        block_b = 1
    else:
        block_b = min(pl.cdiv(B, 2), 128)
    num_blocks = pl.cdiv(B, block_b)
    B_pad = num_blocks * block_b

    x_f = x.astype(jnp.float32)
    if B_pad != B:
        x_f = jnp.pad(x_f, ((0, B_pad - B), (0, 0), (0, 0)))

    if persistent_memory is None:
        pm0 = jnp.zeros((B_pad, 1, PM), jnp.float32)       # init_hidden() behaviour
    else:
        pm0 = persistent_memory.astype(jnp.float32).reshape(B, 1, PM)
        if B_pad != B:
            pm0 = jnp.pad(pm0, ((0, B_pad - B), (0, 0), (0, 0)))

    in_specs = [
        pl.BlockSpec((block_b, T, I), lambda b: (b, 0, 0)),      # x
        pl.BlockSpec((block_b, 1, PM), lambda b: (b, 0, 0)),     # pm0
        pl.BlockSpec((I, 3 * H), lambda b: (0, 0)),              # wih (fused)
        pl.BlockSpec((H, 3 * H), lambda b: (0, 0)),              # whh (fused)
        pl.BlockSpec((1, 3 * H), lambda b: (0, 0)),              # bih
        pl.BlockSpec((1, 3 * H), lambda b: (0, 0)),              # bhh
        pl.BlockSpec((H, PM), lambda b: (0, 0)),                 # whp
        pl.BlockSpec((1, PM), lambda b: (0, 0)),                 # bhp
        pl.BlockSpec((PM, H), lambda b: (0, 0)),                 # wmp
        pl.BlockSpec((1, H), lambda b: (0, 0)),                  # bmp
    ]
    out_specs = (
        pl.BlockSpec((block_b, T, H), lambda b: (b, 0, 0)),      # output (batch_first)
        pl.BlockSpec((block_b, 1, H), lambda b: (b, 0, 0)),      # last hidden
        pl.BlockSpec((block_b, 1, PM), lambda b: (b, 0, 0)),     # new persistent memory
    )
    out_shapes = (
        jax.ShapeDtypeStruct((B_pad, T, H), jnp.float32),
        jax.ShapeDtypeStruct((B_pad, 1, H), jnp.float32),
        jax.ShapeDtypeStruct((B_pad, 1, PM), jnp.float32),
    )

    output, h_last, pm_new = pl.pallas_call(
        functools.partial(_gru_controller_kernel, persistence_factor),
        grid=(num_blocks,),
        in_specs=in_specs,
        out_specs=out_specs,
        out_shape=out_shapes,
        compiler_params=pltpu.CompilerParams(
            dimension_semantics=("parallel",)),      # batch blocks are independent
    )(x_f, pm0,
      params["wih"], params["whh"], params["bih"], params["bhh"],
      params["whp"], params["bhp"], params["wmp"], params["bmp"])

    output = output[:B]
    hidden_state = jnp.transpose(h_last[:B], (1, 0, 2))       # (num_layers=1, B, H)
    return output, {"hidden": hidden_state,
                    "persistent_memory": pm_new[:B, 0, :]}    # (B, PM)


def init_params(key, input_size, hidden_size, persistent_memory_size):
    """Deterministic synthetic parameters (shapes match nn.GRU / nn.Linear),
    stored gate-fused along the last axis ([r | z | n]) and pre-transposed for
    MXU-friendly matmuls."""
    H, I, PM = hidden_size, input_size, persistent_memory_size
    kH = 1.0 / float(H) ** 0.5
    kPM = 1.0 / float(PM) ** 0.5
    ks = jax.random.split(key, 8)
    u = lambda k, shape, lim: jax.random.uniform(
        k, shape, jnp.float32, minval=-lim, maxval=lim)
    return {
        # GRU, gate order [r | z | n] fused along the last axis.
        "wih": u(ks[0], (I, 3 * H), kH),
        "whh": u(ks[1], (H, 3 * H), kH),
        "bih": u(ks[2], (1, 3 * H), kH),
        "bhh": u(ks[3], (1, 3 * H), kH),
        # hidden_projection: Linear(H -> PM)
        "whp": u(ks[4], (H, PM), kH),
        "bhp": u(ks[5], (1, PM), kH),
        # memory_projection: Linear(PM -> H)
        "wmp": u(ks[6], (PM, H), kPM),
        "bmp": u(ks[7], (1, H), kPM),
    }


def reference_forward(x, p, persistence_factor=0.9):
    """Pure-JAX reference replicating torch semantics (for validation)."""
    B, T, I = x.shape
    H = p["whh"].shape[0]
    Wr, Wz, Wn = p["wih"][:, :H], p["wih"][:, H:2 * H], p["wih"][:, 2 * H:]
    Ur, Uz, Un = p["whh"][:, :H], p["whh"][:, H:2 * H], p["whh"][:, 2 * H:]
    bir, biz, bin_ = p["bih"][:, :H], p["bih"][:, H:2 * H], p["bih"][:, 2 * H:]
    bhr, bhz, bhn = p["bhh"][:, :H], p["bhh"][:, H:2 * H], p["bhh"][:, 2 * H:]

    def cell(h, xt):
        r = jax.nn.sigmoid(xt @ Wr + bir + h @ Ur + bhr)
        z = jax.nn.sigmoid(xt @ Wz + biz + h @ Uz + bhz)
        n = jnp.tanh(xt @ Wn + bin_ + r * (h @ Un + bhn))
        h_new = (1.0 - z) * n + z * h
        return h_new, h_new

    h0 = jnp.zeros((B, H), jnp.float32)
    h_last, outs = jax.lax.scan(cell, h0, jnp.transpose(x, (1, 0, 2)))
    outs = jnp.transpose(outs, (1, 0, 2))                     # (B, T, H)
    mem_update = h_last @ p["whp"] + p["bhp"]
    pm_new = (1.0 - persistence_factor) * mem_update          # pm0 == 0
    influence = pm_new @ p["wmp"] + p["bmp"]
    out = outs + 0.3 * influence[:, None, :]
    return out, h_last[None], pm_new


if __name__ == "__main__":
    # Small shapes consistent with the module's forward: x is (batch, seq, input).
    batch, seq, input_size = 2, 8, 16
    hidden_size, pm_size = 32, 64

    key = jax.random.PRNGKey(0)
    k_x, k_p = jax.random.split(key)
    x = jax.random.normal(k_x, (batch, seq, input_size), jnp.float32)
    params = init_params(k_p, input_size, hidden_size, pm_size)

    output, state = persistent_gru_forward(x, params, persistence_factor=0.9)
    output = jax.block_until_ready(output)
    hidden = jax.block_until_ready(state["hidden"])
    pm = jax.block_until_ready(state["persistent_memory"])

    # Validate against a pure-JAX reference.
    out_ref, h_ref, pm_ref = reference_forward(x, params, 0.9)
    assert output.shape == (batch, seq, hidden_size)
    assert hidden.shape == (1, batch, hidden_size)
    assert pm.shape == (batch, pm_size)
    assert jnp.allclose(output, out_ref, rtol=1e-5, atol=1e-5)
    assert jnp.allclose(hidden, h_ref, rtol=1e-5, atol=1e-5)
    assert jnp.allclose(pm, pm_ref, rtol=1e-5, atol=1e-5)

    print("KERNEL_OK")
</pallas_src>

<mosaic_0001>
module attributes {stable_mosaic.version = 11 : i64} {
  func.func @_gru_controller_kernel(%arg0: i32, %arg1: memref<1x8x16xf32, #tpu.memory_space<vmem>>, %arg2: memref<1x1x64xf32, #tpu.memory_space<vmem>>, %arg3: memref<16x96xf32, #tpu.memory_space<vmem>>, %arg4: memref<32x96xf32, #tpu.memory_space<vmem>>, %arg5: memref<1x96xf32, #tpu.memory_space<vmem>>, %arg6: memref<1x96xf32, #tpu.memory_space<vmem>>, %arg7: memref<32x64xf32, #tpu.memory_space<vmem>>, %arg8: memref<1x64xf32, #tpu.memory_space<vmem>>, %arg9: memref<64x32xf32, #tpu.memory_space<vmem>>, %arg10: memref<1x32xf32, #tpu.memory_space<vmem>>, %arg11: memref<1x8x32xf32, #tpu.memory_space<vmem>>, %arg12: memref<1x1x32xf32, #tpu.memory_space<vmem>>, %arg13: memref<1x1x64xf32, #tpu.memory_space<vmem>>) attributes {dimension_semantics = [#tpu.dimension_semantics<parallel>], iteration_bounds = array<i64: 2>, scalar_prefetch = 0 : i64, scratch_operands = 0 : i64, tpu.core_type = #tpu.core_type<tc>, window_params = [{transform_indices = @transform_0, window_bounds = array<i64: 1, 8, 16>}, {transform_indices = @transform_1, window_bounds = array<i64: 1, 1, 64>}, {pipeline_mode = #tpu.pipeline_mode<synchronous>, transform_indices = @transform_2, window_bounds = array<i64: 16, 96>}, {pipeline_mode = #tpu.pipeline_mode<synchronous>, transform_indices = @transform_3, window_bounds = array<i64: 32, 96>}, {pipeline_mode = #tpu.pipeline_mode<synchronous>, transform_indices = @transform_4, window_bounds = array<i64: 1, 96>}, {pipeline_mode = #tpu.pipeline_mode<synchronous>, transform_indices = @transform_5, window_bounds = array<i64: 1, 96>}, {pipeline_mode = #tpu.pipeline_mode<synchronous>, transform_indices = @transform_6, window_bounds = array<i64: 32, 64>}, {pipeline_mode = #tpu.pipeline_mode<synchronous>, transform_indices = @transform_7, window_bounds = array<i64: 1, 64>}, {pipeline_mode = #tpu.pipeline_mode<synchronous>, transform_indices = @transform_8, window_bounds = array<i64: 64, 32>}, {pipeline_mode = #tpu.pipeline_mode<synchronous>, transform_indices = @transform_9, window_bounds = array<i64: 1, 32>}, {transform_indices = @transform_10, window_bounds = array<i64: 1, 8, 32>}, {transform_indices = @transform_11, window_bounds = array<i64: 1, 1, 32>}, {transform_indices = @transform_12, window_bounds = array<i64: 1, 1, 64>}]} {
    %c0 = arith.constant 0 : index
    %c0_0 = arith.constant 0 : index
    %c0_1 = arith.constant 0 : index
    %0 = vector.load %arg1[%c0, %c0_0, %c0_1] : memref<1x8x16xf32, #tpu.memory_space<vmem>>, vector<1x8x16xf32>
    %1 = vector.shape_cast %0 : vector<1x8x16xf32> to vector<8x16xf32>
    %c0_2 = arith.constant 0 : index
    %c0_3 = arith.constant 0 : index
    %2 = vector.load %arg3[%c0_2, %c0_3] : memref<16x96xf32, #tpu.memory_space<vmem>>, vector<16x96xf32>
    %cst = arith.constant dense<0.000000e+00> : vector<8x96xf32>
    %3 = tpu.matmul %1, %2, %cst {dimension_numbers = #tpu.dot_dimension_numbers<[1], [0], [0], [1], [0, 0, 1, 1], [], []>} : vector<8x16xf32>, vector<16x96xf32>, vector<8x96xf32> -> vector<8x96xf32>
    %c0_4 = arith.constant 0 : index
    %c0_5 = arith.constant 0 : index
    %4 = vector.load %arg5[%c0_4, %c0_5] : memref<1x96xf32, #tpu.memory_space<vmem>>, vector<1x96xf32>
    %5 = vector.broadcast %4 : vector<1x96xf32> to vector<8x96xf32>
    %6 = arith.addf %3, %5 : vector<8x96xf32>
    %7 = vector.shape_cast %6 : vector<8x96xf32> to vector<1x8x96xf32>
    %c0_6 = arith.constant 0 : index
    %c0_7 = arith.constant 0 : index
    %8 = vector.load %arg4[%c0_6, %c0_7] : memref<32x96xf32, #tpu.memory_space<vmem>>, vector<32x96xf32>
    %c0_8 = arith.constant 0 : index
    %c0_9 = arith.constant 0 : index
    %9 = vector.load %arg6[%c0_8, %c0_9] : memref<1x96xf32, #tpu.memory_space<vmem>>, vector<1x96xf32>
    %cst_10 = arith.constant 0.000000e+00 : f32
    %10 = vector.broadcast %cst_10 : f32 to vector<1x32xf32>
    %cst_11 = arith.constant dense<0.000000e+00> : vector<1x96xf32>
    %11 = tpu.matmul %10, %8, %cst_11 {dimension_numbers = #tpu.dot_dimension_numbers<[1], [0], [0], [1], [0, 0, 1, 1], [], []>} : vector<1x32xf32>, vector<32x96xf32>, vector<1x96xf32> -> vector<1x96xf32>
    %12 = arith.addf %11, %9 : vector<1x96xf32>
    %13 = vector.extract_strided_slice %7 {offsets = [0, 0, 0], sizes = [1, 1, 96], strides = [1, 1, 1]} : vector<1x8x96xf32> to vector<1x1x96xf32>
    %14 = vector.shape_cast %13 : vector<1x1x96xf32> to vector<1x96xf32>
    %15 = vector.extract_strided_slice %14 {offsets = [0, 0], sizes = [1, 32], strides = [1, 1]} : vector<1x96xf32> to vector<1x32xf32>
    %16 = vector.extract_strided_slice %12 {offsets = [0, 0], sizes = [1, 32], strides = [1, 1]} : vector<1x96xf32> to vector<1x32xf32>
    %17 = arith.addf %15, %16 : vector<1x32xf32>
    %18 = arith.negf %17 : vector<1x32xf32>
    %19 = math.exp %18 : vector<1x32xf32>
    %cst_12 = arith.constant 1.000000e+00 : f32
    %20 = vector.broadcast %cst_12 : f32 to vector<1x32xf32>
    %21 = arith.addf %20, %19 : vector<1x32xf32>
    %22 = arith.divf %20, %21 : vector<1x32xf32>
    %23 = vector.extract_strided_slice %14 {offsets = [0, 32], sizes = [1, 32], strides = [1, 1]} : vector<1x96xf32> to vector<1x32xf32>
    %24 = vector.extract_strided_slice %12 {offsets = [0, 32], sizes = [1, 32], strides = [1, 1]} : vector<1x96xf32> to vector<1x32xf32>
    %25 = arith.addf %23, %24 : vector<1x32xf32>
    %26 = arith.negf %25 : vector<1x32xf32>
    %27 = math.exp %26 : vector<1x32xf32>
    %cst_13 = arith.constant 1.000000e+00 : f32
    %28 = vector.broadcast %cst_13 : f32 to vector<1x32xf32>
    %29 = arith.addf %28, %27 : vector<1x32xf32>
    %30 = arith.divf %28, %29 : vector<1x32xf32>
    %31 = vector.extract_strided_slice %14 {offsets = [0, 64], sizes = [1, 32], strides = [1, 1]} : vector<1x96xf32> to vector<1x32xf32>
    %32 = vector.extract_strided_slice %12 {offsets = [0, 64], sizes = [1, 32], strides = [1, 1]} : vector<1x96xf32> to vector<1x32xf32>
    %33 = arith.mulf %22, %32 : vector<1x32xf32>
    %34 = arith.addf %31, %33 : vector<1x32xf32>
    %35 = math.tanh %34 : vector<1x32xf32>
    %cst_14 = arith.constant 1.000000e+00 : f32
    %36 = vector.broadcast %cst_14 : f32 to vector<1x32xf32>
    %37 = arith.subf %36, %30 : vector<1x32xf32>
    %38 = arith.mulf %37, %35 : vector<1x32xf32>
    %39 = arith.mulf %30, %10 : vector<1x32xf32>
    %40 = arith.addf %38, %39 : vector<1x32xf32>
    %41 = vector.shape_cast %40 : vector<1x32xf32> to vector<1x1x32xf32>
    %c0_15 = arith.constant 0 : index
    %c0_16 = arith.constant 0 : index
    %c0_17 = arith.constant 0 : index
    %42 = vector.load %arg11[%c0_15, %c0_16, %c0_17] : memref<1x8x32xf32, #tpu.memory_space<vmem>>, vector<1x1x32xf32>
    tpu.vector_store %arg11[%c0_15, %c0_16, %c0_17], %41 {strides = array<i32>} : memref<1x8x32xf32, #tpu.memory_space<vmem>>, vector<1x1x32xf32>,
    %cst_18 = arith.constant dense<0.000000e+00> : vector<1x96xf32>
    %43 = tpu.matmul %40, %8, %cst_18 {dimension_numbers = #tpu.dot_dimension_numbers<[1], [0], [0], [1], [0, 0, 1, 1], [], []>} : vector<1x32xf32>, vector<32x96xf32>, vector<1x96xf32> -> vector<1x96xf32>
    %44 = arith.addf %43, %9 : vector<1x96xf32>
    %45 = vector.extract_strided_slice %7 {offsets = [0, 1, 0], sizes = [1, 1, 96], strides = [1, 1, 1]} : vector<1x8x96xf32> to vector<1x1x96xf32>
    %46 = vector.shape_cast %45 : vector<1x1x96xf32> to vector<1x96xf32>
    %47 = vector.extract_strided_slice %46 {offsets = [0, 0], sizes = [1, 32], strides = [1, 1]} : vector<1x96xf32> to vector<1x32xf32>
    %48 = vector.extract_strided_slice %44 {offsets = [0, 0], sizes = [1, 32], strides = [1, 1]} : vector<1x96xf32> to vector<1x32xf32>
    %49 = arith.addf %47, %48 : vector<1x32xf32>
    %50 = arith.negf %49 : vector<1x32xf32>
    %51 = math.exp %50 : vector<1x32xf32>
    %cst_19 = arith.constant 1.000000e+00 : f32
    %52 = vector.broadcast %cst_19 : f32 to vector<1x32xf32>
    %53 = arith.addf %52, %51 : vector<1x32xf32>
    %54 = arith.divf %52, %53 : vector<1x32xf32>
    %55 = vector.extract_strided_slice %46 {offsets = [0, 32], sizes = [1, 32], strides = [1, 1]} : vector<1x96xf32> to vector<1x32xf32>
    %56 = vector.extract_strided_slice %44 {offsets = [0, 32], sizes = [1, 32], strides = [1, 1]} : vector<1x96xf32> to vector<1x32xf32>
    %57 = arith.addf %55, %56 : vector<1x32xf32>
    %58 = arith.negf %57 : vector<1x32xf32>
    %59 = math.exp %58 : vector<1x32xf32>
    %cst_20 = arith.constant 1.000000e+00 : f32
    %60 = vector.broadcast %cst_20 : f32 to vector<1x32xf32>
    %61 = arith.addf %60, %59 : vector<1x32xf32>
    %62 = arith.divf %60, %61 : vector<1x32xf32>
    %63 = vector.extract_strided_slice %46 {offsets = [0, 64], sizes = [1, 32], strides = [1, 1]} : vector<1x96xf32> to vector<1x32xf32>
    %64 = vector.extract_strided_slice %44 {offsets = [0, 64], sizes = [1, 32], strides = [1, 1]} : vector<1x96xf32> to vector<1x32xf32>
    %65 = arith.mulf %54, %64 : vector<1x32xf32>
    %66 = arith.addf %63, %65 : vector<1x32xf32>
    %67 = math.tanh %66 : vector<1x32xf32>
    %cst_21 = arith.constant 1.000000e+00 : f32
    %68 = vector.broadcast %cst_21 : f32 to vector<1x32xf32>
    %69 = arith.subf %68, %62 : vector<1x32xf32>
    %70 = arith.mulf %69, %67 : vector<1x32xf32>
    %71 = arith.mulf %62, %40 : vector<1x32xf32>
    %72 = arith.addf %70, %71 : vector<1x32xf32>
    %73 = vector.shape_cast %72 : vector<1x32xf32> to vector<1x1x32xf32>
    %c0_22 = arith.constant 0 : index
    %c1 = arith.constant 1 : index
    %c0_23 = arith.constant 0 : index
    %74 = vector.load %arg11[%c0_22, %c1, %c0_23] : memref<1x8x32xf32, #tpu.memory_space<vmem>>, vector<1x1x32xf32>
    tpu.vector_store %arg11[%c0_22, %c1, %c0_23], %73 {strides = array<i32>} : memref<1x8x32xf32, #tpu.memory_space<vmem>>, vector<1x1x32xf32>,
    %cst_24 = arith.constant dense<0.000000e+00> : vector<1x96xf32>
    %75 = tpu.matmul %72, %8, %cst_24 {dimension_numbers = #tpu.dot_dimension_numbers<[1], [0], [0], [1], [0, 0, 1, 1], [], []>} : vector<1x32xf32>, vector<32x96xf32>, vector<1x96xf32> -> vector<1x96xf32>
    %76 = arith.addf %75, %9 : vector<1x96xf32>
    %77 = vector.extract_strided_slice %7 {offsets = [0, 2, 0], sizes = [1, 1, 96], strides = [1, 1, 1]} : vector<1x8x96xf32> to vector<1x1x96xf32>
    %78 = vector.shape_cast %77 : vector<1x1x96xf32> to vector<1x96xf32>
    %79 = vector.extract_strided_slice %78 {offsets = [0, 0], sizes = [1, 32], strides = [1, 1]} : vector<1x96xf32> to vector<1x32xf32>
    %80 = vector.extract_strided_slice %76 {offsets = [0, 0], sizes = [1, 32], strides = [1, 1]} : vector<1x96xf32> to vector<1x32xf32>
    %81 = arith.addf %79, %80 : vector<1x32xf32>
    %82 = arith.negf %81 : vector<1x32xf32>
    %83 = math.exp %82 : vector<1x32xf32>
    %cst_25 = arith.constant 1.000000e+00 : f32
    %84 = vector.broadcast %cst_25 : f32 to vector<1x32xf32>
    %85 = arith.addf %84, %83 : vector<1x32xf32>
    %86 = arith.divf %84, %85 : vector<1x32xf32>
    %87 = vector.extract_strided_slice %78 {offsets = [0, 32], sizes = [1, 32], strides = [1, 1]} : vector<1x96xf32> to vector<1x32xf32>
    %88 = vector.extract_strided_slice %76 {offsets = [0, 32], sizes = [1, 32], strides = [1, 1]} : vector<1x96xf32> to vector<1x32xf32>
    %89 = arith.addf %87, %88 : vector<1x32xf32>
    %90 = arith.negf %89 : vector<1x32xf32>
    %91 = math.exp %90 : vector<1x32xf32>
    %cst_26 = arith.constant 1.000000e+00 : f32
    %92 = vector.broadcast %cst_26 : f32 to vector<1x32xf32>
    %93 = arith.addf %92, %91 : vector<1x32xf32>
    %94 = arith.divf %92, %93 : vector<1x32xf32>
    %95 = vector.extract_strided_slice %78 {offsets = [0, 64], sizes = [1, 32], strides = [1, 1]} : vector<1x96xf32> to vector<1x32xf32>
    %96 = vector.extract_strided_slice %76 {offsets = [0, 64], sizes = [1, 32], strides = [1, 1]} : vector<1x96xf32> to vector<1x32xf32>
    %97 = arith.mulf %86, %96 : vector<1x32xf32>
    %98 = arith.addf %95, %97 : vector<1x32xf32>
    %99 = math.tanh %98 : vector<1x32xf32>
    %cst_27 = arith.constant 1.000000e+00 : f32
    %100 = vector.broadcast %cst_27 : f32 to vector<1x32xf32>
    %101 = arith.subf %100, %94 : vector<1x32xf32>
    %102 = arith.mulf %101, %99 : vector<1x32xf32>
    %103 = arith.mulf %94, %72 : vector<1x32xf32>
    %104 = arith.addf %102, %103 : vector<1x32xf32>
    %105 = vector.shape_cast %104 : vector<1x32xf32> to vector<1x1x32xf32>
    %c0_28 = arith.constant 0 : index
    %c2 = arith.constant 2 : index
    %c0_29 = arith.constant 0 : index
    %106 = vector.load %arg11[%c0_28, %c2, %c0_29] : memref<1x8x32xf32, #tpu.memory_space<vmem>>, vector<1x1x32xf32>
    tpu.vector_store %arg11[%c0_28, %c2, %c0_29], %105 {strides = array<i32>} : memref<1x8x32xf32, #tpu.memory_space<vmem>>, vector<1x1x32xf32>,
    %cst_30 = arith.constant dense<0.000000e+00> : vector<1x96xf32>
    %107 = tpu.matmul %104, %8, %cst_30 {dimension_numbers = #tpu.dot_dimension_numbers<[1], [0], [0], [1], [0, 0, 1, 1], [], []>} : vector<1x32xf32>, vector<32x96xf32>, vector<1x96xf32> -> vector<1x96xf32>
    %108 = arith.addf %107, %9 : vector<1x96xf32>
    %109 = vector.extract_strided_slice %7 {offsets = [0, 3, 0], sizes = [1, 1, 96], strides = [1, 1, 1]} : vector<1x8x96xf32> to vector<1x1x96xf32>
    %110 = vector.shape_cast %109 : vector<1x1x96xf32> to vector<1x96xf32>
    %111 = vector.extract_strided_slice %110 {offsets = [0, 0], sizes = [1, 32], strides = [1, 1]} : vector<1x96xf32> to vector<1x32xf32>
    %112 = vector.extract_strided_slice %108 {offsets = [0, 0], sizes = [1, 32], strides = [1, 1]} : vector<1x96xf32> to vector<1x32xf32>
    %113 = arith.addf %111, %112 : vector<1x32xf32>
    %114 = arith.negf %113 : vector<1x32xf32>
    %115 = math.exp %114 : vector<1x32xf32>
    %cst_31 = arith.constant 1.000000e+00 : f32
    %116 = vector.broadcast %cst_31 : f32 to vector<1x32xf32>
    %117 = arith.addf %116, %115 : vector<1x32xf32>
    %118 = arith.divf %116, %117 : vector<1x32xf32>
    %119 = vector.extract_strided_slice %110 {offsets = [0, 32], sizes = [1, 32], strides = [1, 1]} : vector<1x96xf32> to vector<1x32xf32>
    %120 = vector.extract_strided_slice %108 {offsets = [0, 32], sizes = [1, 32], strides = [1, 1]} : vector<1x96xf32> to vector<1x32xf32>
    %121 = arith.addf %119, %120 : vector<1x32xf32>
    %122 = arith.negf %121 : vector<1x32xf32>
    %123 = math.exp %122 : vector<1x32xf32>
    %cst_32 = arith.constant 1.000000e+00 : f32
    %124 = vector.broadcast %cst_32 : f32 to vector<1x32xf32>
    %125 = arith.addf %124, %123 : vector<1x32xf32>
    %126 = arith.divf %124, %125 : vector<1x32xf32>
    %127 = vector.extract_strided_slice %110 {offsets = [0, 64], sizes = [1, 32], strides = [1, 1]} : vector<1x96xf32> to vector<1x32xf32>
    %128 = vector.extract_strided_slice %108 {offsets = [0, 64], sizes = [1, 32], strides = [1, 1]} : vector<1x96xf32> to vector<1x32xf32>
    %129 = arith.mulf %118, %128 : vector<1x32xf32>
    %130 = arith.addf %127, %129 : vector<1x32xf32>
    %131 = math.tanh %130 : vector<1x32xf32>
    %cst_33 = arith.constant 1.000000e+00 : f32
    %132 = vector.broadcast %cst_33 : f32 to vector<1x32xf32>
    %133 = arith.subf %132, %126 : vector<1x32xf32>
    %134 = arith.mulf %133, %131 : vector<1x32xf32>
    %135 = arith.mulf %126, %104 : vector<1x32xf32>
    %136 = arith.addf %134, %135 : vector<1x32xf32>
    %137 = vector.shape_cast %136 : vector<1x32xf32> to vector<1x1x32xf32>
    %c0_34 = arith.constant 0 : index
    %c3 = arith.constant 3 : index
    %c0_35 = arith.constant 0 : index
    %138 = vector.load %arg11[%c0_34, %c3, %c0_35] : memref<1x8x32xf32, #tpu.memory_space<vmem>>, vector<1x1x32xf32>
    tpu.vector_store %arg11[%c0_34, %c3, %c0_35], %137 {strides = array<i32>} : memref<1x8x32xf32, #tpu.memory_space<vmem>>, vector<1x1x32xf32>,
    %cst_36 = arith.constant dense<0.000000e+00> : vector<1x96xf32>
    %139 = tpu.matmul %136, %8, %cst_36 {dimension_numbers = #tpu.dot_dimension_numbers<[1], [0], [0], [1], [0, 0, 1, 1], [], []>} : vector<1x32xf32>, vector<32x96xf32>, vector<1x96xf32> -> vector<1x96xf32>
    %140 = arith.addf %139, %9 : vector<1x96xf32>
    %141 = vector.extract_strided_slice %7 {offsets = [0, 4, 0], sizes = [1, 1, 96], strides = [1, 1, 1]} : vector<1x8x96xf32> to vector<1x1x96xf32>
    %142 = vector.shape_cast %141 : vector<1x1x96xf32> to vector<1x96xf32>
    %143 = vector.extract_strided_slice %142 {offsets = [0, 0], sizes = [1, 32], strides = [1, 1]} : vector<1x96xf32> to vector<1x32xf32>
    %144 = vector.extract_strided_slice %140 {offsets = [0, 0], sizes = [1, 32], strides = [1, 1]} : vector<1x96xf32> to vector<1x32xf32>
    %145 = arith.addf %143, %144 : vector<1x32xf32>
    %146 = arith.negf %145 : vector<1x32xf32>
    %147 = math.exp %146 : vector<1x32xf32>
    %cst_37 = arith.constant 1.000000e+00 : f32
    %148 = vector.broadcast %cst_37 : f32 to vector<1x32xf32>
    %149 = arith.addf %148, %147 : vector<1x32xf32>
    %150 = arith.divf %148, %149 : vector<1x32xf32>
    %151 = vector.extract_strided_slice %142 {offsets = [0, 32], sizes = [1, 32], strides = [1, 1]} : vector<1x96xf32> to vector<1x32xf32>
    %152 = vector.extract_strided_slice %140 {offsets = [0, 32], sizes = [1, 32], strides = [1, 1]} : vector<1x96xf32> to vector<1x32xf32>
    %153 = arith.addf %151, %152 : vector<1x32xf32>
    %154 = arith.negf %153 : vector<1x32xf32>
    %155 = math.exp %154 : vector<1x32xf32>
    %cst_38 = arith.constant 1.000000e+00 : f32
    %156 = vector.broadcast %cst_38 : f32 to vector<1x32xf32>
    %157 = arith.addf %156, %155 : vector<1x32xf32>
    %158 = arith.divf %156, %157 : vector<1x32xf32>
    %159 = vector.extract_strided_slice %142 {offsets = [0, 64], sizes = [1, 32], strides = [1, 1]} : vector<1x96xf32> to vector<1x32xf32>
    %160 = vector.extract_strided_slice %140 {offsets = [0, 64], sizes = [1, 32], strides = [1, 1]} : vector<1x96xf32> to vector<1x32xf32>
    %161 = arith.mulf %150, %160 : vector<1x32xf32>
    %162 = arith.addf %159, %161 : vector<1x32xf32>
    %163 = math.tanh %162 : vector<1x32xf32>
    %cst_39 = arith.constant 1.000000e+00 : f32
    %164 = vector.broadcast %cst_39 : f32 to vector<1x32xf32>
    %165 = arith.subf %164, %158 : vector<1x32xf32>
    %166 = arith.mulf %165, %163 : vector<1x32xf32>
    %167 = arith.mulf %158, %136 : vector<1x32xf32>
    %168 = arith.addf %166, %167 : vector<1x32xf32>
    %169 = vector.shape_cast %168 : vector<1x32xf32> to vector<1x1x32xf32>
    %c0_40 = arith.constant 0 : index
    %c4 = arith.constant 4 : index
    %c0_41 = arith.constant 0 : index
    %170 = vector.load %arg11[%c0_40, %c4, %c0_41] : memref<1x8x32xf32, #tpu.memory_space<vmem>>, vector<1x1x32xf32>
    tpu.vector_store %arg11[%c0_40, %c4, %c0_41], %169 {strides = array<i32>} : memref<1x8x32xf32, #tpu.memory_space<vmem>>, vector<1x1x32xf32>,
    %cst_42 = arith.constant dense<0.000000e+00> : vector<1x96xf32>
    %171 = tpu.matmul %168, %8, %cst_42 {dimension_numbers = #tpu.dot_dimension_numbers<[1], [0], [0], [1], [0, 0, 1, 1], [], []>} : vector<1x32xf32>, vector<32x96xf32>, vector<1x96xf32> -> vector<1x96xf32>
    %172 = arith.addf %171, %9 : vector<1x96xf32>
    %173 = vector.extract_strided_slice %7 {offsets = [0, 5, 0], sizes = [1, 1, 96], strides = [1, 1, 1]} : vector<1x8x96xf32> to vector<1x1x96xf32>
    %174 = vector.shape_cast %173 : vector<1x1x96xf32> to vector<1x96xf32>
    %175 = vector.extract_strided_slice %174 {offsets = [0, 0], sizes = [1, 32], strides = [1, 1]} : vector<1x96xf32> to vector<1x32xf32>
    %176 = vector.extract_strided_slice %172 {offsets = [0, 0], sizes = [1, 32], strides = [1, 1]} : vector<1x96xf32> to vector<1x32xf32>
    %177 = arith.addf %175, %176 : vector<1x32xf32>
    %178 = arith.negf %177 : vector<1x32xf32>
    %179 = math.exp %178 : vector<1x32xf32>
    %cst_43 = arith.constant 1.000000e+00 : f32
    %180 = vector.broadcast %cst_43 : f32 to vector<1x32xf32>
    %181 = arith.addf %180, %179 : vector<1x32xf32>
    %182 = arith.divf %180, %181 : vector<1x32xf32>
    %183 = vector.extract_strided_slice %174 {offsets = [0, 32], sizes = [1, 32], strides = [1, 1]} : vector<1x96xf32> to vector<1x32xf32>
    %184 = vector.extract_strided_slice %172 {offsets = [0, 32], sizes = [1, 32], strides = [1, 1]} : vector<1x96xf32> to vector<1x32xf32>
    %185 = arith.addf %183, %184 : vector<1x32xf32>
    %186 = arith.negf %185 : vector<1x32xf32>
    %187 = math.exp %186 : vector<1x32xf32>
    %cst_44 = arith.constant 1.000000e+00 : f32
    %188 = vector.broadcast %cst_44 : f32 to vector<1x32xf32>
    %189 = arith.addf %188, %187 : vector<1x32xf32>
    %190 = arith.divf %188, %189 : vector<1x32xf32>
    %191 = vector.extract_strided_slice %174 {offsets = [0, 64], sizes = [1, 32], strides = [1, 1]} : vector<1x96xf32> to vector<1x32xf32>
    %192 = vector.extract_strided_slice %172 {offsets = [0, 64], sizes = [1, 32], strides = [1, 1]} : vector<1x96xf32> to vector<1x32xf32>
    %193 = arith.mulf %182, %192 : vector<1x32xf32>
    %194 = arith.addf %191, %193 : vector<1x32xf32>
    %195 = math.tanh %194 : vector<1x32xf32>
    %cst_45 = arith.constant 1.000000e+00 : f32
    %196 = vector.broadcast %cst_45 : f32 to vector<1x32xf32>
    %197 = arith.subf %196, %190 : vector<1x32xf32>
    %198 = arith.mulf %197, %195 : vector<1x32xf32>
    %199 = arith.mulf %190, %168 : vector<1x32xf32>
    %200 = arith.addf %198, %199 : vector<1x32xf32>
    %201 = vector.shape_cast %200 : vector<1x32xf32> to vector<1x1x32xf32>
    %c0_46 = arith.constant 0 : index
    %c5 = arith.constant 5 : index
    %c0_47 = arith.constant 0 : index
    %202 = vector.load %arg11[%c0_46, %c5, %c0_47] : memref<1x8x32xf32, #tpu.memory_space<vmem>>, vector<1x1x32xf32>
    tpu.vector_store %arg11[%c0_46, %c5, %c0_47], %201 {strides = array<i32>} : memref<1x8x32xf32, #tpu.memory_space<vmem>>, vector<1x1x32xf32>,
    %cst_48 = arith.constant dense<0.000000e+00> : vector<1x96xf32>
    %203 = tpu.matmul %200, %8, %cst_48 {dimension_numbers = #tpu.dot_dimension_numbers<[1], [0], [0], [1], [0, 0, 1, 1], [], []>} : vector<1x32xf32>, vector<32x96xf32>, vector<1x96xf32> -> vector<1x96xf32>
    %204 = arith.addf %203, %9 : vector<1x96xf32>
    %205 = vector.extract_strided_slice %7 {offsets = [0, 6, 0], sizes = [1, 1, 96], strides = [1, 1, 1]} : vector<1x8x96xf32> to vector<1x1x96xf32>
    %206 = vector.shape_cast %205 : vector<1x1x96xf32> to vector<1x96xf32>
    %207 = vector.extract_strided_slice %206 {offsets = [0, 0], sizes = [1, 32], strides = [1, 1]} : vector<1x96xf32> to vector<1x32xf32>
    %208 = vector.extract_strided_slice %204 {offsets = [0, 0], sizes = [1, 32], strides = [1, 1]} : vector<1x96xf32> to vector<1x32xf32>
    %209 = arith.addf %207, %208 : vector<1x32xf32>
    %210 = arith.negf %209 : vector<1x32xf32>
    %211 = math.exp %210 : vector<1x32xf32>
    %cst_49 = arith.constant 1.000000e+00 : f32
    %212 = vector.broadcast %cst_49 : f32 to vector<1x32xf32>
    %213 = arith.addf %212, %211 : vector<1x32xf32>
    %214 = arith.divf %212, %213 : vector<1x32xf32>
    %215 = vector.extract_strided_slice %206 {offsets = [0, 32], sizes = [1, 32], strides = [1, 1]} : vector<1x96xf32> to vector<1x32xf32>
    %216 = vector.extract_strided_slice %204 {offsets = [0, 32], sizes = [1, 32], strides = [1, 1]} : vector<1x96xf32> to vector<1x32xf32>
    %217 = arith.addf %215, %216 : vector<1x32xf32>
    %218 = arith.negf %217 : vector<1x32xf32>
    %219 = math.exp %218 : vector<1x32xf32>
    %cst_50 = arith.constant 1.000000e+00 : f32
    %220 = vector.broadcast %cst_50 : f32 to vector<1x32xf32>
    %221 = arith.addf %220, %219 : vector<1x32xf32>
    %222 = arith.divf %220, %221 : vector<1x32xf32>
    %223 = vector.extract_strided_slice %206 {offsets = [0, 64], sizes = [1, 32], strides = [1, 1]} : vector<1x96xf32> to vector<1x32xf32>
    %224 = vector.extract_strided_slice %204 {offsets = [0, 64], sizes = [1, 32], strides = [1, 1]} : vector<1x96xf32> to vector<1x32xf32>
    %225 = arith.mulf %214, %224 : vector<1x32xf32>
    %226 = arith.addf %223, %225 : vector<1x32xf32>
    %227 = math.tanh %226 : vector<1x32xf32>
    %cst_51 = arith.constant 1.000000e+00 : f32
    %228 = vector.broadcast %cst_51 : f32 to vector<1x32xf32>
    %229 = arith.subf %228, %222 : vector<1x32xf32>
    %230 = arith.mulf %229, %227 : vector<1x32xf32>
    %231 = arith.mulf %222, %200 : vector<1x32xf32>
    %232 = arith.addf %230, %231 : vector<1x32xf32>
    %233 = vector.shape_cast %232 : vector<1x32xf32> to vector<1x1x32xf32>
    %c0_52 = arith.constant 0 : index
    %c6 = arith.constant 6 : index
    %c0_53 = arith.constant 0 : index
    %234 = vector.load %arg11[%c0_52, %c6, %c0_53] : memref<1x8x32xf32, #tpu.memory_space<vmem>>, vector<1x1x32xf32>
    tpu.vector_store %arg11[%c0_52, %c6, %c0_53], %233 {strides = array<i32>} : memref<1x8x32xf32, #tpu.memory_space<vmem>>, vector<1x1x32xf32>,
    %cst_54 = arith.constant dense<0.000000e+00> : vector<1x96xf32>
    %235 = tpu.matmul %232, %8, %cst_54 {dimension_numbers = #tpu.dot_dimension_numbers<[1], [0], [0], [1], [0, 0, 1, 1], [], []>} : vector<1x32xf32>, vector<32x96xf32>, vector<1x96xf32> -> vector<1x96xf32>
    %236 = arith.addf %235, %9 : vector<1x96xf32>
    %237 = vector.extract_strided_slice %7 {offsets = [0, 7, 0], sizes = [1, 1, 96], strides = [1, 1, 1]} : vector<1x8x96xf32> to vector<1x1x96xf32>
    %238 = vector.shape_cast %237 : vector<1x1x96xf32> to vector<1x96xf32>
    %239 = vector.extract_strided_slice %238 {offsets = [0, 0], sizes = [1, 32], strides = [1, 1]} : vector<1x96xf32> to vector<1x32xf32>
    %240 = vector.extract_strided_slice %236 {offsets = [0, 0], sizes = [1, 32], strides = [1, 1]} : vector<1x96xf32> to vector<1x32xf32>
    %241 = arith.addf %239, %240 : vector<1x32xf32>
    %242 = arith.negf %241 : vector<1x32xf32>
    %243 = math.exp %242 : vector<1x32xf32>
    %cst_55 = arith.constant 1.000000e+00 : f32
    %244 = vector.broadcast %cst_55 : f32 to vector<1x32xf32>
    %245 = arith.addf %244, %243 : vector<1x32xf32>
    %246 = arith.divf %244, %245 : vector<1x32xf32>
    %247 = vector.extract_strided_slice %238 {offsets = [0, 32], sizes = [1, 32], strides = [1, 1]} : vector<1x96xf32> to vector<1x32xf32>
    %248 = vector.extract_strided_slice %236 {offsets = [0, 32], sizes = [1, 32], strides = [1, 1]} : vector<1x96xf32> to vector<1x32xf32>
    %249 = arith.addf %247, %248 : vector<1x32xf32>
    %250 = arith.negf %249 : vector<1x32xf32>
    %251 = math.exp %250 : vector<1x32xf32>
    %cst_56 = arith.constant 1.000000e+00 : f32
    %252 = vector.broadcast %cst_56 : f32 to vector<1x32xf32>
    %253 = arith.addf %252, %251 : vector<1x32xf32>
    %254 = arith.divf %252, %253 : vector<1x32xf32>
    %255 = vector.extract_strided_slice %238 {offsets = [0, 64], sizes = [1, 32], strides = [1, 1]} : vector<1x96xf32> to vector<1x32xf32>
    %256 = vector.extract_strided_slice %236 {offsets = [0, 64], sizes = [1, 32], strides = [1, 1]} : vector<1x96xf32> to vector<1x32xf32>
    %257 = arith.mulf %246, %256 : vector<1x32xf32>
    %258 = arith.addf %255, %257 : vector<1x32xf32>
    %259 = math.tanh %258 : vector<1x32xf32>
    %cst_57 = arith.constant 1.000000e+00 : f32
    %260 = vector.broadcast %cst_57 : f32 to vector<1x32xf32>
    %261 = arith.subf %260, %254 : vector<1x32xf32>
    %262 = arith.mulf %261, %259 : vector<1x32xf32>
    %263 = arith.mulf %254, %232 : vector<1x32xf32>
    %264 = arith.addf %262, %263 : vector<1x32xf32>
    %265 = vector.shape_cast %264 : vector<1x32xf32> to vector<1x1x32xf32>
    %c0_58 = arith.constant 0 : index
    %c7 = arith.constant 7 : index
    %c0_59 = arith.constant 0 : index
    %266 = vector.load %arg11[%c0_58, %c7, %c0_59] : memref<1x8x32xf32, #tpu.memory_space<vmem>>, vector<1x1x32xf32>
    tpu.vector_store %arg11[%c0_58, %c7, %c0_59], %265 {strides = array<i32>} : memref<1x8x32xf32, #tpu.memory_space<vmem>>, vector<1x1x32xf32>,
    %c0_60 = arith.constant 0 : index
    %c0_61 = arith.constant 0 : index
    %267 = vector.load %arg7[%c0_60, %c0_61] : memref<32x64xf32, #tpu.memory_space<vmem>>, vector<32x64xf32>
    %cst_62 = arith.constant dense<0.000000e+00> : vector<1x64xf32>
    %268 = tpu.matmul %264, %267, %cst_62 {dimension_numbers = #tpu.dot_dimension_numbers<[1], [0], [0], [1], [0, 0, 1, 1], [], []>} : vector<1x32xf32>, vector<32x64xf32>, vector<1x64xf32> -> vector<1x64xf32>
    %c0_63 = arith.constant 0 : index
    %c0_64 = arith.constant 0 : index
    %269 = vector.load %arg8[%c0_63, %c0_64] : memref<1x64xf32, #tpu.memory_space<vmem>>, vector<1x64xf32>
    %270 = arith.addf %268, %269 : vector<1x64xf32>
    %c0_65 = arith.constant 0 : index
    %c0_66 = arith.constant 0 : index
    %c0_67 = arith.constant 0 : index
    %271 = vector.load %arg2[%c0_65, %c0_66, %c0_67] : memref<1x1x64xf32, #tpu.memory_space<vmem>>, vector<1x1x64xf32>
    %272 = vector.shape_cast %271 : vector<1x1x64xf32> to vector<1x64xf32>
    %cst_68 = arith.constant 0.899999976 : f32
    %273 = vector.broadcast %cst_68 : f32 to vector<1x64xf32>
    %274 = arith.mulf %273, %272 : vector<1x64xf32>
    %cst_69 = arith.constant 1.000000e-01 : f32
    %275 = vector.broadcast %cst_69 : f32 to vector<1x64xf32>
    %276 = arith.mulf %275, %270 : vector<1x64xf32>
    %277 = arith.addf %274, %276 : vector<1x64xf32>
    %c0_70 = arith.constant 0 : index
    %c0_71 = arith.constant 0 : index
    %278 = vector.load %arg9[%c0_70, %c0_71] : memref<64x32xf32, #tpu.memory_space<vmem>>, vector<64x32xf32>
    %cst_72 = arith.constant dense<0.000000e+00> : vector<1x32xf32>
    %279 = tpu.matmul %277, %278, %cst_72 {dimension_numbers = #tpu.dot_dimension_numbers<[1], [0], [0], [1], [0, 0, 1, 1], [], []>} : vector<1x64xf32>, vector<64x32xf32>, vector<1x32xf32> -> vector<1x32xf32>
    %c0_73 = arith.constant 0 : index
    %c0_74 = arith.constant 0 : index
    %280 = vector.load %arg10[%c0_73, %c0_74] : memref<1x32xf32, #tpu.memory_space<vmem>>, vector<1x32xf32>
    %281 = arith.addf %279, %280 : vector<1x32xf32>
    %c0_75 = arith.constant 0 : index
    %c0_76 = arith.constant 0 : index
    %c0_77 = arith.constant 0 : index
    %282 = vector.load %arg11[%c0_75, %c0_76, %c0_77] : memref<1x8x32xf32, #tpu.memory_space<vmem>>, vector<1x8x32xf32>
    %283 = vector.shape_cast %281 : vector<1x32xf32> to vector<1x1x32xf32>
    %cst_78 = arith.constant 3.000000e-01 : f32
    %284 = vector.broadcast %cst_78 : f32 to vector<1x1x32xf32>
    %285 = arith.mulf %284, %283 : vector<1x1x32xf32>
    %286 = vector.broadcast %285 : vector<1x1x32xf32> to vector<1x8x32xf32>
    %287 = arith.addf %282, %286 : vector<1x8x32xf32>
    %c0_79 = arith.constant 0 : index
    %c0_80 = arith.constant 0 : index
    %c0_81 = arith.constant 0 : index
    %288 = vector.load %arg11[%c0_79, %c0_80, %c0_81] : memref<1x8x32xf32, #tpu.memory_space<vmem>>, vector<1x8x32xf32>
    tpu.vector_store %arg11[%c0_79, %c0_80, %c0_81], %287 {strides = array<i32>} : memref<1x8x32xf32, #tpu.memory_space<vmem>>, vector<1x8x32xf32>,
    %289 = vector.shape_cast %264 : vector<1x32xf32> to vector<1x1x32xf32>
    %c0_82 = arith.constant 0 : index
    %c0_83 = arith.constant 0 : index
    %c0_84 = arith.constant 0 : index
    %290 = vector.load %arg12[%c0_82, %c0_83, %c0_84] : memref<1x1x32xf32, #tpu.memory_space<vmem>>, vector<1x1x32xf32>
    tpu.vector_store %arg12[%c0_82, %c0_83, %c0_84], %289 {strides = array<i32>} : memref<1x1x32xf32, #tpu.memory_space<vmem>>, vector<1x1x32xf32>,
    %291 = vector.shape_cast %277 : vector<1x64xf32> to vector<1x1x64xf32>
    %c0_85 = arith.constant 0 : index
    %c0_86 = arith.constant 0 : index
    %c0_87 = arith.constant 0 : index
    %292 = vector.load %arg13[%c0_85, %c0_86, %c0_87] : memref<1x1x64xf32, #tpu.memory_space<vmem>>, vector<1x1x64xf32>
    tpu.vector_store %arg13[%c0_85, %c0_86, %c0_87], %291 {strides = array<i32>} : memref<1x1x64xf32, #tpu.memory_space<vmem>>, vector<1x1x64xf32>,
    return
  }
  func.func @transform_0(%arg0: i32) -> (i32, i32, i32) {
    %c0_i32 = arith.constant 0 : i32
    %c0_i32_0 = arith.constant 0 : i32
    %c0_i32_1 = arith.constant 0 : i32
    return %arg0, %c0_i32, %c0_i32_0 : i32, i32, i32
  }
  func.func @transform_1(%arg0: i32) -> (i32, i32, i32) {
    %c0_i32 = arith.constant 0 : i32
    %c0_i32_0 = arith.constant 0 : i32
    %c0_i32_1 = arith.constant 0 : i32
    return %arg0, %c0_i32, %c0_i32_0 : i32, i32, i32
  }
  func.func @transform_2(%arg0: i32) -> (i32, i32) {
    %c0_i32 = arith.constant 0 : i32
    %c0_i32_0 = arith.constant 0 : i32
    %c0_i32_1 = arith.constant 0 : i32
    return %c0_i32, %c0_i32_0 : i32, i32
  }
  func.func @transform_3(%arg0: i32) -> (i32, i32) {
    %c0_i32 = arith.constant 0 : i32
    %c0_i32_0 = arith.constant 0 : i32
    %c0_i32_1 = arith.constant 0 : i32
    return %c0_i32, %c0_i32_0 : i32, i32
  }
  func.func @transform_4(%arg0: i32) -> (i32, i32) {
    %c0_i32 = arith.constant 0 : i32
    %c0_i32_0 = arith.constant 0 : i32
    %c0_i32_1 = arith.constant 0 : i32
    return %c0_i32, %c0_i32_0 : i32, i32
  }
  func.func @transform_5(%arg0: i32) -> (i32, i32) {
    %c0_i32 = arith.constant 0 : i32
    %c0_i32_0 = arith.constant 0 : i32
    %c0_i32_1 = arith.constant 0 : i32
    return %c0_i32, %c0_i32_0 : i32, i32
  }
  func.func @transform_6(%arg0: i32) -> (i32, i32) {
    %c0_i32 = arith.constant 0 : i32
    %c0_i32_0 = arith.constant 0 : i32
    %c0_i32_1 = arith.constant 0 : i32
    return %c0_i32, %c0_i32_0 : i32, i32
  }
  func.func @transform_7(%arg0: i32) -> (i32, i32) {
    %c0_i32 = arith.constant 0 : i32
    %c0_i32_0 = arith.constant 0 : i32
    %c0_i32_1 = arith.constant 0 : i32
    return %c0_i32, %c0_i32_0 : i32, i32
  }
  func.func @transform_8(%arg0: i32) -> (i32, i32) {
    %c0_i32 = arith.constant 0 : i32
    %c0_i32_0 = arith.constant 0 : i32
    %c0_i32_1 = arith.constant 0 : i32
    return %c0_i32, %c0_i32_0 : i32, i32
  }
  func.func @transform_9(%arg0: i32) -> (i32, i32) {
    %c0_i32 = arith.constant 0 : i32
    %c0_i32_0 = arith.constant 0 : i32
    %c0_i32_1 = arith.constant 0 : i32
    return %c0_i32, %c0_i32_0 : i32, i32
  }
  func.func @transform_10(%arg0: i32) -> (i32, i32, i32) {
    %c0_i32 = arith.constant 0 : i32
    %c0_i32_0 = arith.constant 0 : i32
    %c0_i32_1 = arith.constant 0 : i32
    return %arg0, %c0_i32, %c0_i32_0 : i32, i32, i32
  }
  func.func @transform_11(%arg0: i32) -> (i32, i32, i32) {
    %c0_i32 = arith.constant 0 : i32
    %c0_i32_0 = arith.constant 0 : i32
    %c0_i32_1 = arith.constant 0 : i32
    return %arg0, %c0_i32, %c0_i32_0 : i32, i32, i32
  }
  func.func @transform_12(%arg0: i32) -> (i32, i32, i32) {
    %c0_i32 = arith.constant 0 : i32
    %c0_i32_0 = arith.constant 0 : i32
    %c0_i32_1 = arith.constant 0 : i32
    return %arg0, %c0_i32, %c0_i32_0 : i32, i32, i32
  }
}

</mosaic_0001>

<bundles_post_ra>
// kernel: tpu_custom_call.1
= control target key start
LH: loop header
LB: loop body
LE: loop exit
PB: predicated region body
PF: predicated region fallthrough
CT: control target
= control target key end

     0   :  { %s2766_s0 = inlined_call_operand.vmem [shape: f32[2,8,16], index: 0, kind: input, shape index: {}]   ;;  %s2767_s1 = inlined_call_operand.vmem [shape: f32[2,1,64], index: 1, kind: input, shape index: {}]   ;;  %s2768_s2 = inlined_call_operand.vmem [shape: f32[16,96], index: 2, kind: input, shape index: {}]   ;;  %s2769_s3 = inlined_call_operand.vmem [shape: f32[32,96], index: 3, kind: input, shape index: {}]   ;;  %s2770_s4 = inlined_call_operand.vmem [shape: f32[1,96], index: 4, kind: input, shape index: {}]   ;;  %s2771_s5 = inlined_call_operand.vmem [shape: f32[1,96], index: 5, kind: input, shape index: {}]   ;;  %s2772_s6 = inlined_call_operand.vmem [shape: f32[32,64], index: 6, kind: input, shape index: {}]   ;;  %s2773_s7 = inlined_call_operand.vmem [shape: f32[1,64], index: 7, kind: input, shape index: {}]   ;;  %s2774_s8 = inlined_call_operand.vmem [shape: f32[64,32], index: 8, kind: input, shape index: {}]   ;;  %s2775_s9 = inlined_call_operand.vmem [shape: f32[1,32], index: 9, kind: input, shape index: {}]   ;;  %s2776_s10 = inlined_call_operand.hbm [shape: f32[2,8,32], index: 10, kind: output, shape index: {0}]   ;;  %s2777_s11 = inlined_call_operand.hbm [shape: f32[2,1,32], index: 11, kind: output, shape index: {1}]   ;;  %s2778_s12 = inlined_call_operand.hbm [shape: f32[2,1,64], index: 12, kind: output, shape index: {2}]  }
   0x1   :  { %2782 = sst [smem:[#allocation9_spill]] %s2766_s0 }
   0x2   :  { %2783 = sst [smem:[#allocation10_spill]] %s2767_s1 }
   0x3   :  { %2784 = sst [smem:[#allocation11_spill]] %s2768_s2 }
   0x4   :  { %2785 = sst [smem:[#allocation12_spill]] %s2769_s3 }
   0x5   :  { %2786 = sst [smem:[#allocation13_spill]] %s2770_s4 }
   0x6   :  { %2787 = sst [smem:[#allocation14_spill]] %s2771_s5 }
   0x7   :  { %18 = vsyncpa [#allocation3], 0 }
   0x8   :  { %20 = vsyncpa [#allocation3 + $0x1], 0 }
   0x9   :  { %21 = vsyncpa [#allocation5], 0 }
   0xa   :  { %23 = vsyncpa [#allocation5 + $0x1], 0  ;;  %s2336_s21 = smov 0   ;;  %s2338_s22 = smov 0  }
   0xb   :  { %s2340_s23 = smov 0   ;;  %s2342_s24 = smov 0  }
   0xc LB: > { %s2357_s25 = sadd.s32 4294967295, %s2261_s24   ;;  %s2779_s26 = sadd.s32 4294967294, %s2261_s24   ;;  %s2261_s24 = sphi %s2342_s24, %s2802_s24   ;;  %s2257_s23 = sphi %s2340_s23, %s2801_s23   ;;  %s2253_s22 = sphi %s2338_s22, %s2800_s22   ;;  %s2249_s21 = sphi %s2336_s21, %s2799_s21  }
   0xd   : > { %s2361_s27 = sadd.s32 1, %s2261_s24   ;;  %s256_s28 = sadd.s32 1, %s2257_s23 }
   0xe   : > { %s253_s29 = ssub.s32 %s2261_s24, %s2361_s27  ;;  %p266_p0 = scmp.ne.s32.totalorder %s2257_s23, %s2253_s22 }
   0xf   : > { %p254_p1 = scmp.eq.s32.totalorder %s253_s29, 0  ;;  %p267_p2 = scmp.eq.s32.totalorder %s2357_s25, 1 }
  0x10   : > { %p272_p3 = scmp.ne.s32.totalorder %s2253_s22, %s2249_s21  ;;  %p273_p4 = scmp.eq.s32.totalorder %s2779_s26, 1 }
  0x11   : > { %s2374_s30 = scalar_select %p254_p1, %s2257_s23, %s256_s28  }
  0x12   : > { %p2376_p5 = por %p267_p2, %p266_p0  ;;  %p2380_p6 = por %p273_p4, %p272_p3 }
  0x13   : > { %p1758_p7 = scmp.ge.s32.totalorder %s2261_s24, 1  ;;  %p380_p8 = scmp.lt.s32.totalorder %s2261_s24, 3 }
  0x15   : > { %p381_p9 = pnand %p1758_p7, %p380_p8 }
  0x16   : > { %s2790_s2 = sld [smem:[#allocation11_spill]] (!%p381_p9)  ;;  %p432_p10 = scmp.lt.s32.totalorder (!%p381_p9), %s2357_s25, 1  ;;  %v2263_v2 = vmov (!%p381_p9), 0.0|0.0   ;;  %vm2264_vm0 = vmmov (!%p381_p9), 0   ;;  %v2265_v4 = vmov (!%p381_p9), 0.0   ;;  %vm449_vm1 = vcmask (!%p381_p9), 130048  }
  0x17   : > { %384 = sbr.rel (%p381_p9) target bundleno = 6067 (0x17b3), region = 60  ;;  %1968 = vmatprep.subr.bf16.mxu1 (!%p381_p9), %v2263_v2  ;;  %1847 = vmatprep.mubr.msk.f32.mxu1 (!%p381_p9), %vm2264_vm0, %v2265_v4  ;;  %s2791_s3 = sld [smem:[#allocation12_spill]] (!%p381_p9)  ;;  %vm632_vm2 = vcmask (!%p381_p9), 253952   ;;  %vm528_vm3 = vcmask (!%p381_p9), 261120   ;;  %vm740_vm4 = vcmask (!%p381_p9), 254977   ;;  %vm962_vm5 = vcmask (!%p381_p9), 257027  }
  0x18   : > { %1977 = vmatprep.subr.bf16.mxu0 (!%p381_p9), %v2263_v2  ;;  %1869 = vmatprep.mubr.msk.f32.mxu0 (!%p381_p9), %vm2264_vm0, %v2265_v4  ;;  %s2792_s0 = sld [smem:[#allocation9_spill]] (!%p381_p9)  ;;  %s2793_s5 = sld [smem:[#allocation14_spill]] (!%p381_p9)  ;;  %vm1184_vm6 = vcmask (!%p381_p9), 259077   ;;  %vm1406_vm7 = vcmask (!%p381_p9), 261127   ;;  %vm851_vm8 = vcmask (!%p381_p9), 256002   ;;  %vm1073_vm9 = vcmask (!%p381_p9), 258052  }
  0x19   : > { %s2266_s17 = smov (!%p381_p9), 64   ;;  %s2794_s4 = sld [smem:[#allocation13_spill]] (!%p381_p9)  ;;  %vm1295_vm10 = vcmask (!%p381_p9), 260102   ;;  %vm1501_vm11 = vcmask (!%p381_p9), 523264   ;;  %vm1584_vm12 = vcmask (!%p381_p9), 516096  }
  0x1a   : > { %s2267_s20 = smov (!%p381_p9), 96   ;;  %s2458_s28 = sand.u32 (!%p381_p9), 1, %s2253_s22  }
  0x1b   : > { %s1759_s29 = sshll.u32 (!%p381_p9), %s2458_s28, 3  ;;  %s2795_s1 = sld [smem:[#allocation10_spill]] (!%p381_p9) }
  0x1c   : > { %v440_v0 = vld [vmem:[%s2790_s2] sm:$0xff] (!%p381_p9)  ;;  %v441_v1 = vld [vmem:[%s2790_s2 + $0x8] sm:$0xff] (!%p381_p9)  ;;  %s2781_s18 = scalar_lea.vmem (!%p381_p9), [#allocation6], %s2458_s28  ;;  %s1782_s19 = sshll.u32 (!%p381_p9), %s2357_s25, 4 }
  0x1d   : > { %v1969_v3 = vpack.c.bf16 (!%p381_p9), %v441_v1, %v440_v0  ;;  %v523_v5 = vld [vmem:[%s2791_s3] sm:$0xff] (!%p381_p9)  ;;  %v524_v6 = vld [vmem:[%s2791_s3 + $0x8] sm:$0xff] (!%p381_p9)  ;;  %v525_v8 = vld [vmem:[%s2791_s3 + $0x10] sm:$0xff] (!%p381_p9) }
  0x1e   : > { %s2403_s15 = scalar_select %p432_p10, %s2357_s25, 1  ;;  %v2405_v7 = vpack.c.bf16 %v524_v6, %v523_v5  ;;  %v526_v9 = vld [vmem:[%s2791_s3 + $0x18] sm:$0xff]  ;;  %v2443_v14 = vld [vmem:[%s2793_s5] sm:$0x1] }
  0x1f   : > { %1970 = vmatpush3.bf16.msra.mxu1 %v1969_v3  ;;  %v2423_v11 = vpack.c.bf16 %v526_v9, %v525_v8  ;;  %v1761_v18 = vld [vmem:[%s2794_s4] ss:$0 sm:$0xff] }
  0x20   : > { %1971 = vmatprep.subr.bf16.mxu1 %v2263_v2  ;;  %s1760_s16 = sshll.u32 %s2403_s15, 3  ;;  %1979 = vmatpush3.bf16.msra.mxu0 %v2405_v7 }
  0x21   : > { %s435_s26 = scalar_lea.vmem %s2792_s0, %s1760_s16  ;;  %1980 = vmatprep.subr.bf16.mxu0 %v2263_v2  ;;  %s2780_s0 = scalar_lea.vmem [#allocation4], %s2458_s28 }
  0x22   : > { %v439_v10 = vld [vmem:[%s435_s26] sm:$0xff]  ;;  %s2461_s26 = scalar_lea.vmem [#allocation2], %s1759_s29  ;;  %s438_s3 = scalar_lea.vmem %s2795_s1, %s2403_s15 }
  0x23   : > { %1848 = vmatmul.mubr.msk.f32.vlgmr.msra.gmra.mrb[0].mxu1 %vm449_vm1, %v439_v10  ;;  %s1591_s15 = sand.u32 1, %s2357_s25   ;;  %s2268_s1 = smov [#allocation4]  }
  0x24   : > { %1973 = vmatpush3.bf16.msra.mxu1 %v2405_v7  ;;  %1858 = vmatprep.mubr.msk.f32.mxu1 %vm2264_vm0, %v2265_v4 }
  0x25   : > { %1974 = vmatprep.subr.bf16.mxu1 %v2263_v2  ;;  %1982 = vmatpush3.bf16.msra.mxu0 %v2423_v11 }
  0x26   : > { %1989 = vmatprep.subr.bf16.mxu0 %v2263_v2 }
  0x28   : > { %1976 = vmatpush3.bf16.msra.mxu1 %v2423_v11 }
  0x29   : > { %1983 = vmatprep.subr.bf16.mxu1 %v2263_v2 }
  0x2b   : > { %1859 = vmatmul.mubr.f32.vlgmr.msra.gmra.mrb[2].mxu1 %v2265_v4 }
  0x2c   : > { %1985 = vmatpush3.bf16.msra.mxu1 %v2405_v7  ;;  %1880 = vmatprep.mubr.msk.f32.mxu1 %vm2264_vm0, %v2265_v4 }
  0x2d   : > { %1986 = vmatprep.subr.bf16.mxu1 %v2263_v2 }
  0x30   : > { %1988 = vmatpush3.bf16.msra.mxu1 %v2423_v11 }
  0x31   : > { %1995 = vmatprep.subr.bf16.mxu1 %v2263_v2 }
  0xf6   : > { %v519_v12 = vpop.f32.mrb[0].mxu1 }
  0xf7   : > { %v1849_v13 = vpop.f32.mrb[1].mxu1  ;;  %v2450_v19 = vadd.f32 %v1761_v18, %v519_v12 }
  0xfe   : > { %v598_v15 = vpop.f32.mrb[2].mxu1 }
  0xff   : > { %v599_v16 = vadd.f32 %v598_v15, %v2443_v14  ;;  %v1860_v17 = vpop.f32.mrb[3].mxu1 }
 0x101   : > { %610 = vrot.lane.b32.xlu0 %v599_v16, %s2266_s17  ;;  %v602_v20 = vadd.f32 %v599_v16, %v2450_v19 }
 0x103   : > { %v1763_v21 = vmul.f32 -1.442695, %v602_v20 }
 0x105   : > { %2091 = vpow2.f32 %v1763_v21 }
 0x10f   : > { %v2092_v22 = vpop.eup %2091 }
 0x110   : > { %v606_v23 = vadd.f32 1.0, %v2092_v22 }
 0x112   : > { %2093 = vrcp.f32 %v606_v23 }
 0x11c   : > { %v2094_v24 = vpop.eup %2093 }
 0x11d   : > { %v620_v30 = vsub.f32 1.0, %v2094_v24  ;;  %v626_v32 = vmul.f32 0.0, %v2094_v24 }
 0x173   : > { %v611_v25 = vpop.permute.xlu0 %610 }
 0x174   : > { %v613_v26 = vmul.f32 %v2094_v24, %v611_v25 }
 0x176   : > { %615 = vrot.lane.b32.xlu0 %v613_v26, %s2266_s17 }
 0x1e8   : > { %v616_v27 = vpop.permute.xlu0 %615 }
 0x1e9   : > { %v618_v28 = vadd.f32 %v616_v27, %v2450_v19 }
 0x1eb   : > { %2095 = vtanh.f32 %v618_v28 }
 0x1f5   : > { %v2096_v29 = vpop.eup %2095 }
 0x1f6   : > { %622 = vrot.lane.b32.xlu1 %v2096_v29, %s2267_s20 }
 0x268   : > { %v623_v31 = vpop.permute.xlu1 %622 }
 0x269   : > { %v625_v33 = vmul.f32 %v623_v31, %v620_v30 }
 0x26b   : > { %v627_v34 = vadd.f32 %v626_v32, %v625_v33 }
 0x26d   : > { %629 = vrot.lane.b32.xlu1 %v627_v34, %s2267_s20  ;;  %v732_v50 = vrot.slane %v627_v34, 7 }
 0x2df   : > { %v630_v35 = vpop.permute.xlu1 %629 }
 0x2e0   : > { %633 = vst.msk [vmem:[%s2461_s26] sm:$0x1] %vm632_vm2, %v630_v35  ;;  %1870 = vmatmul.mubr.msk.f32.vlgmr.msra.gmra.mrb[0].mxu0 %vm528_vm3, %v630_v35 }
 0x2e1   : > { %1991 = vmatpush3.bf16.msra.mxu0 %v2405_v7  ;;  %1891 = vmatprep.mubr.msk.f32.mxu0 %vm2264_vm0, %v2265_v4 }
 0x2e2   : > { %1992 = vmatprep.subr.bf16.mxu0 %v2263_v2 }
 0x2e5   : > { %1994 = vmatpush3.bf16.msra.mxu0 %v2423_v11 }
 0x2e6   : > { %2001 = vmatprep.subr.bf16.mxu0 %v2263_v2 }
 0x3b3   : > { %v702_v36 = vpop.f32.mrb[0].mxu0 }
 0x3b4   : > { %v703_v37 = vadd.f32 %v702_v36, %v2443_v14  ;;  %v1871_v38 = vpop.f32.mrb[1].mxu0 }
 0x3b6   : > { %v707_v39 = vrot.slane %v703_v37, 7 }
 0x3b8   : > { %716 = vrot.lane.b32.xlu0 %v707_v39, %s2266_s17  ;;  %v709_v40 = vadd.f32 %v707_v39, %v2450_v19 }
 0x3ba   : > { %v1765_v41 = vmul.f32 -1.442695, %v709_v40 }
 0x3bc   : > { %2097 = vpow2.f32 %v1765_v41 }
 0x3c6   : > { %v2098_v42 = vpop.eup %2097 }
 0x3c7   : > { %v713_v43 = vadd.f32 1.0, %v2098_v42 }
 0x3c9   : > { %2099 = vrcp.f32 %v713_v43 }
 0x3d3   : > { %v2100_v44 = vpop.eup %2099 }
 0x3d4   : > { %v726_v51 = vsub.f32 1.0, %v2100_v44  ;;  %v734_v54 = vmul.f32 %v2100_v44, %v732_v50 }
 0x42a   : > { %v717_v45 = vpop.permute.xlu0 %716 }
 0x42b   : > { %v719_v46 = vmul.f32 %v2100_v44, %v717_v45 }
 0x42d   : > { %721 = vrot.lane.b32.xlu1 %v719_v46, %s2266_s17 }
 0x49f   : > { %v722_v47 = vpop.permute.xlu1 %721 }
 0x4a0   : > { %v724_v48 = vadd.f32 %v722_v47, %v2450_v19 }
 0x4a2   : > { %2101 = vtanh.f32 %v724_v48 }
 0x4ac   : > { %v2102_v49 = vpop.eup %2101 }
 0x4ad   : > { %728 = vrot.lane.b32.xlu0 %v2102_v49, %s2267_s20 }
 0x51f   : > { %v729_v52 = vpop.permute.xlu0 %728 }
 0x520   : > { %v731_v53 = vmul.f32 %v729_v52, %v726_v51 }
 0x522   : > { %v2477_v55 = vadd.f32 %v734_v54, %v731_v53 }
 0x524   : > { %v742_v56 = vrot.slane %v2477_v55, 1  ;;  %v843_v13 = vrot.slane %v2477_v55, 7 }
 0x526   : > { %743 = vrot.lane.b32.xlu1 %v742_v56, %s2267_s20 }
 0x598   : > { %v744_v57 = vpop.permute.xlu1 %743 }
 0x599   : > { %1881 = vmatmul.mubr.msk.f32.vlgmr.msra.gmra.mrb[4].mxu1 %vm528_vm3, %v744_v57 }
 0x59a   : > { %1997 = vmatpush3.bf16.msra.mxu1 %v2405_v7  ;;  %1902 = vmatprep.mubr.msk.f32.mxu1 %vm2264_vm0, %v2265_v4 }
 0x59b   : > { %1998 = vmatprep.subr.bf16.mxu1 %v2263_v2 }
 0x59e   : > { %2000 = vmatpush3.bf16.msra.mxu1 %v2423_v11 }
 0x59f   : > { %2007 = vmatprep.subr.bf16.mxu1 %v2263_v2 }
 0x66c   : > { %v813_v58 = vpop.f32.mrb[4].mxu1 }
 0x66d   : > { %v814_v59 = vadd.f32 %v813_v58, %v2443_v14  ;;  %v1882_v60 = vpop.f32.mrb[5].mxu1 }
 0x66f   : > { %v818_v61 = vrot.slane %v814_v59, 6 }
 0x671   : > { %827 = vrot.lane.b32.xlu0 %v818_v61, %s2266_s17  ;;  %v820_v62 = vadd.f32 %v818_v61, %v2450_v19 }
 0x673   : > { %v1767_v63 = vmul.f32 -1.442695, %v820_v62 }
 0x675   : > { %2103 = vpow2.f32 %v1767_v63 }
 0x67f   : > { %v2104_v0 = vpop.eup %2103 }
 0x680   : > { %v824_v1 = vadd.f32 1.0, %v2104_v0 }
 0x682   : > { %2105 = vrcp.f32 %v824_v1 }
 0x68c   : > { %v2106_v3 = vpop.eup %2105 }
 0x68d   : > { %v837_v12 = vsub.f32 1.0, %v2106_v3  ;;  %v845_v16 = vmul.f32 %v2106_v3, %v843_v13 }
 0x6e3   : > { %v828_v5 = vpop.permute.xlu0 %827 }
 0x6e4   : > { %v830_v6 = vmul.f32 %v2106_v3, %v828_v5 }
 0x6e6   : > { %832 = vrot.lane.b32.xlu1 %v830_v6, %s2266_s17 }
 0x758   : > { %v833_v8 = vpop.permute.xlu1 %832 }
 0x759   : > { %v835_v9 = vadd.f32 %v833_v8, %v2450_v19 }
 0x75b   : > { %2107 = vtanh.f32 %v835_v9 }
 0x765   : > { %v2108_v10 = vpop.eup %2107 }
 0x766   : > { %839 = vrot.lane.b32.xlu0 %v2108_v10, %s2267_s20 }
 0x7d8   : > { %v840_v15 = vpop.permute.xlu0 %839 }
 0x7d9   : > { %v842_v17 = vmul.f32 %v840_v15, %v837_v12 }
 0x7db   : > { %v2495_v18 = vadd.f32 %v845_v16, %v842_v17 }
 0x7dd   : > { %v853_v20 = vrot.slane %v2495_v18, 2  ;;  %v954_v37 = vrot.slane %v2495_v18, 7 }
 0x7df   : > { %854 = vrot.lane.b32.xlu1 %v853_v20, %s2267_s20 }
 0x851   : > { %v855_v21 = vpop.permute.xlu1 %854 }
 0x852   : > { %1892 = vmatmul.mubr.msk.f32.vlgmr.msra.gmra.mrb[2].mxu0 %vm528_vm3, %v855_v21 }
 0x853   : > { %2003 = vmatpush3.bf16.msra.mxu0 %v2405_v7  ;;  %1913 = vmatprep.mubr.msk.f32.mxu0 %vm2264_vm0, %v2265_v4 }
 0x854   : > { %2004 = vmatprep.subr.bf16.mxu0 %v2263_v2 }
 0x857   : > { %2006 = vmatpush3.bf16.msra.mxu0 %v2423_v11 }
 0x858   : > { %2013 = vmatprep.subr.bf16.mxu0 %v2263_v2 }
 0x925   : > { %v924_v22 = vpop.f32.mrb[2].mxu0 }
 0x926   : > { %v925_v23 = vadd.f32 %v924_v22, %v2443_v14  ;;  %v1893_v24 = vpop.f32.mrb[3].mxu0 }
 0x928   : > { %v929_v25 = vrot.slane %v925_v23, 5 }
 0x92a   : > { %938 = vrot.lane.b32.xlu0 %v929_v25, %s2266_s17  ;;  %v931_v26 = vadd.f32 %v929_v25, %v2450_v19 }
 0x92c   : > { %v1769_v27 = vmul.f32 -1.442695, %v931_v26 }
 0x92e   : > { %2109 = vpow2.f32 %v1769_v27 }
 0x938   : > { %v2110_v28 = vpop.eup %2109 }
 0x939   : > { %v935_v29 = vadd.f32 1.0, %v2110_v28 }
 0x93b   : > { %2111 = vrcp.f32 %v935_v29 }
 0x945   : > { %v2112_v30 = vpop.eup %2111 }
 0x946   : > { %v948_v36 = vsub.f32 1.0, %v2112_v30  ;;  %v956_v39 = vmul.f32 %v2112_v30, %v954_v37 }
 0x99c   : > { %v939_v31 = vpop.permute.xlu0 %938 }
 0x99d   : > { %v941_v32 = vmul.f32 %v2112_v30, %v939_v31 }
 0x99f   : > { %943 = vrot.lane.b32.xlu1 %v941_v32, %s2266_s17 }
 0xa11   : > { %v944_v33 = vpop.permute.xlu1 %943 }
 0xa12   : > { %v946_v34 = vadd.f32 %v944_v33, %v2450_v19 }
 0xa14   : > { %2113 = vtanh.f32 %v946_v34 }
 0xa1e   : > { %v2114_v35 = vpop.eup %2113 }
 0xa1f   : > { %950 = vrot.lane.b32.xlu0 %v2114_v35, %s2267_s20 }
 0xa91   : > { %v951_v38 = vpop.permute.xlu0 %950 }
 0xa92   : > { %v953_v40 = vmul.f32 %v951_v38, %v948_v36 }
 0xa94   : > { %v2513_v41 = vadd.f32 %v956_v39, %v953_v40 }
 0xa96   : > { %v964_v42 = vrot.slane %v2513_v41, 3  ;;  %v1065_v60 = vrot.slane %v2513_v41, 7 }
 0xa98   : > { %965 = vrot.lane.b32.xlu1 %v964_v42, %s2267_s20 }
 0xb0a   : > { %v966_v43 = vpop.permute.xlu1 %965 }
 0xb0b   : > { %1903 = vmatmul.mubr.msk.f32.vlgmr.msra.gmra.mrb[6].mxu1 %vm528_vm3, %v966_v43 }
 0xb0c   : > { %2009 = vmatpush3.bf16.msra.mxu1 %v2405_v7  ;;  %1924 = vmatprep.mubr.msk.f32.mxu1 %vm2264_vm0, %v2265_v4 }
 0xb0d   : > { %2010 = vmatprep.subr.bf16.mxu1 %v2263_v2 }
 0xb10   : > { %2012 = vmatpush3.bf16.msra.mxu1 %v2423_v11 }
 0xb11   : > { %2019 = vmatprep.subr.bf16.mxu1 %v2263_v2 }
 0xbde   : > { %v1035_v44 = vpop.f32.mrb[6].mxu1 }
 0xbdf   : > { %v1036_v45 = vadd.f32 %v1035_v44, %v2443_v14  ;;  %v1904_v46 = vpop.f32.mrb[7].mxu1 }
 0xbe1   : > { %v1040_v47 = vrot.slane %v1036_v45, 4 }
 0xbe3   : > { %1049 = vrot.lane.b32.xlu0 %v1040_v47, %s2266_s17  ;;  %v1042_v48 = vadd.f32 %v1040_v47, %v2450_v19 }
 0xbe5   : > { %v1771_v49 = vmul.f32 -1.442695, %v1042_v48 }
 0xbe7   : > { %2115 = vpow2.f32 %v1771_v49 }
 0xbf1   : > { %v2116_v50 = vpop.eup %2115 }
 0xbf2   : > { %v1046_v51 = vadd.f32 1.0, %v2116_v50 }
 0xbf4   : > { %2117 = vrcp.f32 %v1046_v51 }
 0xbfe   : > { %v2118_v52 = vpop.eup %2117 }
 0xbff   : > { %v1059_v59 = vsub.f32 1.0, %v2118_v52  ;;  %v1067_v62 = vmul.f32 %v2118_v52, %v1065_v60 }
 0xc55   : > { %v1050_v53 = vpop.permute.xlu0 %1049 }
 0xc56   : > { %v1052_v54 = vmul.f32 %v2118_v52, %v1050_v53 }
 0xc58   : > { %1054 = vrot.lane.b32.xlu1 %v1052_v54, %s2266_s17 }
 0xcca   : > { %v1055_v56 = vpop.permute.xlu1 %1054 }
 0xccb   : > { %v1057_v57 = vadd.f32 %v1055_v56, %v2450_v19 }
 0xccd   : > { %2119 = vtanh.f32 %v1057_v57 }
 0xcd7   : > { %v2120_v58 = vpop.eup %2119 }
 0xcd8   : > { %1061 = vrot.lane.b32.xlu0 %v2120_v58, %s2267_s20 }
 0xd4a   : > { %v1062_v61 = vpop.permute.xlu0 %1061 }
 0xd4b   : > { %v1064_v63 = vmul.f32 %v1062_v61, %v1059_v59 }
 0xd4d   : > { %v2531_v0 = vadd.f32 %v1067_v62, %v1064_v63 }
 0xd4f   : > { %v1075_v1 = vrot.slane %v2531_v0, 4  ;;  %v1176_v23 = vrot.slane %v2531_v0, 7 }
 0xd51   : > { %1076 = vrot.lane.b32.xlu1 %v1075_v1, %s2267_s20 }
 0xdc3   : > { %v1077_v3 = vpop.permute.xlu1 %1076 }
 0xdc4   : > { %1914 = vmatmul.mubr.msk.f32.vlgmr.msra.gmra.mrb[4].mxu0 %vm528_vm3, %v1077_v3 }
 0xdc5   : > { %2015 = vmatpush3.bf16.msra.mxu0 %v2405_v7  ;;  %1935 = vmatprep.mubr.msk.f32.mxu0 %vm2264_vm0, %v2265_v4 }
 0xdc6   : > { %2016 = vmatprep.subr.bf16.mxu0 %v2263_v2 }
 0xdc9   : > { %2018 = vmatpush3.bf16.msra.mxu0 %v2423_v11 }
 0xdca   : > { %2025 = vmatprep.subr.bf16.mxu0 %v2263_v2 }
 0xe97   : > { %v1146_v5 = vpop.f32.mrb[4].mxu0 }
 0xe98   : > { %v1147_v6 = vadd.f32 %v1146_v5, %v2443_v14  ;;  %v1915_v8 = vpop.f32.mrb[5].mxu0  ;;  %v1408_v5 = vld [vmem:[%s2772_s6] sm:$0xff] }
 0xe99   : > { %v1410_v8 = vld [vmem:[%s2772_s6 + $0x10] sm:$0xff] }
 0xe9a   : > { %v1151_v9 = vrot.slane %v1147_v6, 3  ;;  %v1409_v6 = vld [vmem:[%s2772_s6 + $0x8] sm:$0xff] }
 0xe9c   : > { %1160 = vrot.lane.b32.xlu0 %v1151_v9, %s2266_s17  ;;  %v1153_v10 = vadd.f32 %v1151_v9, %v2450_v19  ;;  %v1411_v9 = vld [vmem:[%s2772_s6 + $0x18] sm:$0xff] }
 0xe9e   : > { %v1773_v12 = vmul.f32 -1.442695, %v1153_v10 }
 0xea0   : > { %2121 = vpow2.f32 %v1773_v12 }
 0xeaa   : > { %v2122_v7 = vpop.eup %2121 }
 0xeab   : > { %v1157_v13 = vadd.f32 1.0, %v2122_v7 }
 0xead   : > { %2123 = vrcp.f32 %v1157_v13 }
 0xeb7   : > { %v2124_v15 = vpop.eup %2123 }
 0xeb8   : > { %v1170_v22 = vsub.f32 1.0, %v2124_v15  ;;  %v1178_v25 = vmul.f32 %v2124_v15, %v1176_v23  ;;  %v1495_v23 = vld [vmem:[%s2774_s8 + $0x18] sm:$0xff] }
 0xf0e   : > { %v1161_v16 = vpop.permute.xlu0 %1160 }
 0xf0f   : > { %v1163_v17 = vmul.f32 %v2124_v15, %v1161_v16 }
 0xf11   : > { %1165 = vrot.lane.b32.xlu1 %v1163_v17, %s2266_s17 }
 0xf83   : > { %v1166_v11 = vpop.permute.xlu1 %1165 }
 0xf84   : > { %v1168_v20 = vadd.f32 %v1166_v11, %v2450_v19  ;;  %v1492_v11 = vld [vmem:[%s2774_s8] sm:$0xff] }
 0xf86   : > { %2125 = vtanh.f32 %v1168_v20  ;;  %v1493_v20 = vld [vmem:[%s2774_s8 + $0x8] sm:$0xff] }
 0xf90   : > { %v2126_v21 = vpop.eup %2125 }
 0xf91   : > { %1172 = vrot.lane.b32.xlu0 %v2126_v21, %s2267_s20  ;;  %v1494_v21 = vld [vmem:[%s2774_s8 + $0x10] sm:$0xff] }
0x1003   : > { %v1173_v24 = vpop.permute.xlu0 %1172 }
0x1004   : > { %v1175_v26 = vmul.f32 %v1173_v24, %v1170_v22  ;;  %v2026_v22 = vpack.c.bf16 %v1493_v20, %v1492_v11 }
0x1006   : > { %v2549_v27 = vadd.f32 %v1178_v25, %v1175_v26  ;;  %v2029_v25 = vpack.c.bf16 %v1495_v23, %v1494_v21 }
0x1008   : > { %v1186_v28 = vrot.slane %v2549_v27, 5  ;;  %v1287_v46 = vrot.slane %v2549_v27, 7 }
0x100a   : > { %1187 = vrot.lane.b32.xlu1 %v1186_v28, %s2267_s20 }
0x107c   : > { %v1188_v29 = vpop.permute.xlu1 %1187 }
0x107d   : > { %1925 = vmatmul.mubr.msk.f32.vlgmr.msra.gmra.mrb[8].mxu1 %vm528_vm3, %v1188_v29 }
0x107e   : > { %1946 = vmatprep.mubr.msk.f32.mxu1 %vm2264_vm0, %v2265_v4 }
0x1150   : > { %v1257_v30 = vpop.f32.mrb[8].mxu1 }
0x1151   : > { %v1258_v31 = vadd.f32 %v1257_v30, %v2443_v14  ;;  %v1926_v32 = vpop.f32.mrb[9].mxu1  ;;  %v1496_v30 = vld [vmem:[%s2774_s8 + $0x20] sm:$0xff] }
0x1153   : > { %v1262_v33 = vrot.slane %v1258_v31, 2  ;;  %v1497_v31 = vld [vmem:[%s2774_s8 + $0x28] sm:$0xff] }
0x1154   : > { %v2032_v32 = vpack.c.bf16 %v1497_v31, %v1496_v30 }
0x1155   : > { %1271 = vrot.lane.b32.xlu0 %v1262_v33, %s2266_s17  ;;  %v1264_v34 = vadd.f32 %v1262_v33, %v2450_v19  ;;  %v1498_v33 = vld [vmem:[%s2774_s8 + $0x30] sm:$0xff] }
0x1157   : > { %v1775_v35 = vmul.f32 -1.442695, %v1264_v34  ;;  %v1499_v34 = vld [vmem:[%s2774_s8 + $0x38] sm:$0xff] }
0x1159   : > { %2127 = vpow2.f32 %v1775_v35  ;;  %v2035_v35 = vpack.c.bf16 %v1499_v34, %v1498_v33 }
0x1163   : > { %v2128_v36 = vpop.eup %2127 }
0x1164   : > { %v1268_v37 = vadd.f32 1.0, %v2128_v36  ;;  %v1488_v36 = vld [vmem:[%s438_s3] sm:$0x1]  ;;  %s2663_s3 = scalar_lea.sflag [#allocation5], %s1591_s15 }
0x1166   : > { %2129 = vrcp.f32 %v1268_v37 }
0x1170   : > { %v2130_v38 = vpop.eup %2129 }
0x1171   : > { %v1281_v45 = vsub.f32 1.0, %v2130_v38  ;;  %v1289_v48 = vmul.f32 %v2130_v38, %v1287_v46 }
0x11c7   : > { %v1272_v39 = vpop.permute.xlu0 %1271 }
0x11c8   : > { %v1274_v40 = vmul.f32 %v2130_v38, %v1272_v39  ;;  %v1489_v39 = vmul.f32 0.9, %v1488_v36 }
0x11ca   : > { %1276 = vrot.lane.b32.xlu1 %v1274_v40, %s2266_s17 }
0x123c   : > { %v1277_v42 = vpop.permute.xlu1 %1276 }
0x123d   : > { %v1279_v43 = vadd.f32 %v1277_v42, %v2450_v19 }
0x123f   : > { %2131 = vtanh.f32 %v1279_v43 }
0x1249   : > { %v2132_v44 = vpop.eup %2131 }
0x124a   : > { %1283 = vrot.lane.b32.xlu0 %v2132_v44, %s2267_s20 }
0x12bc   : > { %v1284_v47 = vpop.permute.xlu0 %1283 }
0x12bd   : > { %v1286_v49 = vmul.f32 %v1284_v47, %v1281_v45 }
0x12bf   : > { %v2563_v50 = vadd.f32 %v1289_v48, %v1286_v49 }
0x12c1   : > { %v1297_v51 = vrot.slane %v2563_v50, 6  ;;  %v1398_v12 = vrot.slane %v2563_v50, 7 }
0x12c3   : > { %1298 = vrot.lane.b32.xlu1 %v1297_v51, %s2267_s20 }
0x1335   : > { %v1299_v52 = vpop.permute.xlu1 %1298 }
0x1336   : > { %1936 = vmatmul.mubr.msk.f32.vlgmr.msra.gmra.mrb[6].mxu0 %vm528_vm3, %v1299_v52 }
0x1337   : > { %1965 = vmatprep.mubr.msk.f32.mxu0 %vm2264_vm0, %v2265_v4  ;;  %2027 = vmatpush3.bf16.msra.mxu0 %v2026_v22 }
0x1338   : > { %2028 = vmatprep.subr.bf16.mxu0 %v2263_v2 }
0x133b   : > { %2030 = vmatpush3.bf16.msra.mxu0 %v2029_v25 }
0x133c   : > { %2031 = vmatprep.subr.bf16.mxu0 %v2263_v2 }
0x133f   : > { %2033 = vmatpush3.bf16.msra.mxu0 %v2032_v32 }
0x1340   : > { %2034 = vmatprep.subr.bf16.mxu0 %v2263_v2 }
0x1343   : > { %2036 = vmatpush3.bf16.msra.mxu0 %v2035_v35 }
0x1409   : > { %v1368_v53 = vpop.f32.mrb[6].mxu0 }
0x140a   : > { %v1369_v54 = vadd.f32 %v1368_v53, %v2443_v14  ;;  %v1937_v56 = vpop.f32.mrb[7].mxu0 }
0x140c   : > { %v1373_v57 = vrot.slane %v1369_v54, 1 }
0x140e   : > { %1382 = vrot.lane.b32.xlu0 %v1373_v57, %s2266_s17  ;;  %v1375_v58 = vadd.f32 %v1373_v57, %v2450_v19 }
0x1410   : > { %v1777_v59 = vmul.f32 -1.442695, %v1375_v58 }
0x1412   : > { %2133 = vpow2.f32 %v1777_v59 }
0x141c   : > { %v2134_v60 = vpop.eup %2133 }
0x141d   : > { %v1379_v61 = vadd.f32 1.0, %v2134_v60 }
0x141f   : > { %2135 = vrcp.f32 %v1379_v61 }
0x1429   : > { %v2136_v62 = vpop.eup %2135 }
0x142a   : > { %v1392_v10 = vsub.f32 1.0, %v2136_v62  ;;  %v1400_v13 = vmul.f32 %v2136_v62, %v1398_v12 }
0x1480   : > { %v1383_v63 = vpop.permute.xlu0 %1382 }
0x1481   : > { %v1385_v1 = vmul.f32 %v2136_v62, %v1383_v63 }
0x1483   : > { %1387 = vrot.lane.b32.xlu1 %v1385_v1, %s2266_s17  ;;  %s2659_s17 = scalar_lea.hbm %s2777_s11, %s1782_s19 }
0x14f5   : > { %v1388_v4 = vpop.permute.xlu1 %1387 }
0x14f6   : > { %v1390_v3 = vadd.f32 %v1388_v4, %v2450_v19  ;;  %v2020_v19 = vpack.c.bf16 %v1409_v6, %v1408_v5 }
0x14f8   : > { %2137 = vtanh.f32 %v1390_v3  ;;  %2021 = vmatpush3.bf16.msra.mxu1 %v2020_v19 }
0x14f9   : > { %2022 = vmatprep.subr.bf16.mxu1 %v2263_v2  ;;  %v1412_v2 = vld [vmem:[%s2773_s7] sm:$0x1] }
0x1502   : > { %v2138_v14 = vpop.eup %2137 }
0x1503   : > { %1394 = vrot.lane.b32.xlu0 %v2138_v14, %s2267_s20 }
0x1507   : > { %737 = vrot.lane.b32.xlu0 %v2477_v55, %s2267_s20  ;;  %v2023_v55 = vpack.c.bf16 %v1411_v9, %v1410_v8 }
0x1509   : > { %2024 = vmatpush3.bf16.msra.mxu1 %v2023_v55 }
0x150b   : > { %959 = vrot.lane.b32.xlu0 %v2513_v41, %s2267_s20 }
0x150f   : > { %1181 = vrot.lane.b32.xlu0 %v2549_v27, %s2267_s20 }
0x1575   : > { %v1395_v7 = vpop.permute.xlu0 %1394 }
0x1576   : > { %v1397_v15 = vmul.f32 %v1395_v7, %v1392_v10 }
0x1578   : > { %v1401_v16 = vadd.f32 %v1400_v13, %v1397_v15 }
0x1579   : > { %v738_v17 = vpop.permute.xlu0 %737 }
0x157a   : > { %741 = vst.msk [vmem:[%s2461_s26] sm:$0x2] %vm740_vm4, %v738_v17  ;;  %1403 = vrot.lane.b32.xlu0 %v1401_v16, %s2267_s20  ;;  %v1413_v41 = vrot.slane %v1401_v16, 7 }
0x157c   : > { %1414 = vrot.lane.b32.xlu1 %v1413_v41, %s2267_s20 }
0x157d   : > { %v960_v24 = vpop.permute.xlu0 %959 }
0x157e   : > { %963 = vst.msk [vmem:[%s2461_s26] sm:$0x8] %vm962_vm5, %v960_v24 }
0x1580   : > { %848 = vrot.lane.b32.xlu1 %v2495_v18, %s2267_s20 }
0x1581   : > { %v1182_v26 = vpop.permute.xlu0 %1181 }
0x1582   : > { %1185 = vst.msk [vmem:[%s2461_s26] sm:$0x20] %vm1184_vm6, %v1182_v26 }
0x1584   : > { %1070 = vrot.lane.b32.xlu1 %v2531_v0, %s2267_s20 }
0x1588   : > { %1292 = vrot.lane.b32.xlu1 %v2563_v50, %s2267_s20  ;;  %s2796_s20 = scalar_lea.vmem [#allocation4], %s2458_s28 }
0x1589   : > { %s1621_s2 = sshll.u32 %s2796_s20, 4  ;;  %s1622_s2 = int_to_ptr.vmem [resolvable:$true] %s1621_s2 }
0x158a   : > { %s2139_s16 = scalar_lea.vmem %s1622_s2, 16 }
0x158b   : > { %p2140_p11 = scmp.ne.s32.totalorder %s1622_s2, %s2139_s16 }
0x158d   : > { %p2141_p12 = pnand %p2140_p11, %p2376_p5 }
0x158f   : > { %p2142_p13 = pneg %p2141_p12 }
0x15ec   : > { %v1404_v27 = vpop.permute.xlu0 %1403 }
0x15ed   : > { %1407 = vst.msk [vmem:[%s2461_s26] sm:$0x80] %vm1406_vm7, %v1404_v27  ;;  %1583 = vst.msk [vmem:[%s2780_s0 - $0x7] sm:$0x80] %vm1406_vm7, %v1404_v27 }
0x15ee   : > { %v1415_v18 = vpop.permute.xlu1 %1414 }
0x15ef   : > { %1947 = vmatmul.mubr.msk.f32.vlgmr.msra.gmra.mrb[10].mxu1 %vm528_vm3, %v1415_v18 }
0x15f2   : > { %v849_v28 = vpop.permute.xlu1 %848 }
0x15f3   : > { %852 = vst.msk [vmem:[%s2461_s26] sm:$0x4] %vm851_vm8, %v849_v28 }
0x15f6   : > { %v1071_v29 = vpop.permute.xlu1 %1070 }
0x15f7   : > { %1074 = vst.msk [vmem:[%s2461_s26] sm:$0x10] %vm1073_vm9, %v1071_v29 }
0x15fa   : > { %v1293_v0 = vpop.permute.xlu1 %1292 }
0x15fb   : > { %1296 = vst.msk [vmem:[%s2461_s26] sm:$0x40] %vm1295_vm10, %v1293_v0 }
0x16c2   : > { %v1484_v37 = vpop.f32.mrb[10].mxu1 }
0x16c3   : > { %v1485_v38 = vadd.f32 %v1484_v37, %v1412_v2  ;;  %v1948_v40 = vpop.f32.mrb[11].mxu1 }
0x16c5   : > { %v1490_v42 = vmul.f32 0.1, %v1485_v38 }
0x16c7   : > { %v1491_v43 = vadd.f32 %v1490_v42, %v1489_v39 }
0x16c9   : > { %1966 = vmatmul.mubr.msk.f32.vlgmr.msra.gmra.mrb[8].mxu0 %vm1501_vm11, %v1491_v43  ;;  %1585 = vst.msk [vmem:[%s2781_s18] sm:$0x1] %vm1584_vm12, %v1491_v43  ;;  %s2143_s18 = sshll.u32 %s2268_s1, 4  ;;  %s2144_s18 = int_to_ptr.vmem [resolvable:$false] %s2143_s18 }
0x16ca   : > { %s2145_s4 = scalar_lea.vmem %s2144_s18, 32  ;;  %p2146_p0 = scmp.lt.s32.totalorder %s1622_s2, %s2144_s18 }
0x16cb   : > { %p2147_p1 = scmp.lt.s32.totalorder %s2145_s4, %s2139_s16 }
0x16cd   : > { %p2148_p2 = por %p2147_p1, %p2146_p0 }
0x16cf   : > { %p2149_p3 = pnand %p2148_p2, %p2142_p13 }
0x16d1   : > { %2152 = shalt.err (!%p2149_p3)
}
0x16d2   : > { %s2153_s15 = scalar_lea.hbm %s2659_s17, 16  ;;  %s2157_s1 = scalar_lea.hbm %s2777_s11, 32 }
0x16d3   : > { %p2154_p4 = scmp.ne.s32.totalorder %s2659_s17, %s2153_s15  ;;  %p2158_p9 = scmp.lt.u32.totalorder %s2659_s17, %s2777_s11 }
0x16d4   : > { %p2159_p10 = scmp.lt.u32.totalorder %s2157_s1, %s2153_s15  ;;  %p2161_p12 = scmp.lt.u32.totalorder %s2153_s15, %s2659_s17 }
0x16d5   : > { %p2155_p7 = pnand %p2154_p4, %p2376_p5 }
0x16d6   : > { %p2160_p11 = por %p2159_p10, %p2158_p9 }
0x16d7   : > { %p2156_p8 = pneg %p2155_p7 }
0x16d8   : > { %p2162_p13 = por %p2161_p12, %p2160_p11 }
0x16da   : > { %p2163_p0 = pnand %p2162_p13, %p2156_p8 }
0x16dc   : > { %2166 = shalt.err (!%p2163_p0)
}
0x16dd   : > { %2038 = dma.vmem_to_hbm [thread:$0]  (%p2376_p5), %s1622_s2, 16, %s2659_s17, %s2663_s3  }
0x16de   : > { %s2688_s0 = scalar_lea.hbm %s2778_s12, %s1782_s19  ;;  %s2797_s29 = scalar_lea.vmem [#allocation6], %s2458_s28 }
0x16df   : > { %s1634_s1 = sshll.u32 %s2797_s29, 4  ;;  %s2269_s20 = smov [#allocation6]   ;;  %s1635_s1 = int_to_ptr.vmem [resolvable:$true] %s1634_s1 }
0x16e0   : > { %s2167_s15 = scalar_lea.vmem %s1635_s1, 16  ;;  %s2171_s18 = sshll.u32 %s2269_s20, 4  ;;  %s2172_s18 = int_to_ptr.vmem [resolvable:$false] %s2171_s18 }
0x16e1   : > { %p2168_p1 = scmp.ne.s32.totalorder %s1635_s1, %s2167_s15  ;;  %s2173_s5 = scalar_lea.vmem %s2172_s18, 32 }
0x16e2   : > { %p2174_p4 = scmp.lt.s32.totalorder %s1635_s1, %s2172_s18  ;;  %p2175_p7 = scmp.lt.s32.totalorder %s2173_s5, %s2167_s15 }
0x16e3   : > { %p2169_p2 = pnand %p2168_p1, %p2376_p5 }
0x16e4   : > { %p2176_p8 = por %p2175_p7, %p2174_p4 }
0x16e5   : > { %p2170_p3 = pneg %p2169_p2 }
0x16e7   : > { %p2177_p9 = pnand %p2176_p8, %p2170_p3 }
0x16e9   : > { %2180 = shalt.err (!%p2177_p9)
}
0x16ea   : > { %s2181_s19 = scalar_lea.hbm %s2688_s0, 16  ;;  %s2185_s4 = scalar_lea.hbm %s2778_s12, 32 }
0x16eb   : > { %p2182_p10 = scmp.ne.s32.totalorder %s2688_s0, %s2181_s19  ;;  %p2186_p13 = scmp.lt.u32.totalorder %s2688_s0, %s2778_s12 }
0x16ec   : > { %p2187_p0 = scmp.lt.u32.totalorder %s2185_s4, %s2181_s19  ;;  %p2189_p2 = scmp.lt.u32.totalorder %s2181_s19, %s2688_s0 }
0x16ed   : > { %p2183_p11 = pnand %p2182_p10, %p2376_p5 }
0x16ee   : > { %p2188_p1 = por %p2187_p0, %p2186_p13 }
0x16ef   : > { %p2184_p12 = pneg %p2183_p11 }
0x16f0   : > { %p2190_p3 = por %p2189_p2, %p2188_p1 }
0x16f2   : > { %p2191_p4 = pnand %p2190_p3, %p2184_p12 }
0x16f4   : > { %2194 = shalt.err (!%p2191_p4)
}
0x16f5   : > { %2039 = dma.vmem_to_hbm [thread:$0]  (%p2376_p5), %s1635_s1, 16, %s2688_s0, %s2663_s3   ;;  %v1577_v44 = vlaneseq  ;;  %v1500_v46 = vld [vmem:[%s2775_s9] sm:$0x1] }
0x16f6   : > { %s1781_s20 = sshll.u32 %s2357_s25, 7  ;;  %s1608_s18 = sshll.u32 %s2461_s26, 4  ;;  %v1575_v53 = vld [vmem:[%s2461_s26] sm:$0xff]  ;;  %s2721_s18 = int_to_ptr.vmem [resolvable:$true] %s1608_s18 }
0x16f7   : > { %v1578_v45 = vshrl.u32 %v1577_v44, 7  ;;  %s2719_s1 = scalar_lea.hbm %s2776_s10, %s1781_s20  ;;  %s1587_s19 = scalar_lea.sflag [#allocation3], %s2458_s28 }
0x16f8   : > { %s2195_s17 = scalar_lea.vmem %s2721_s18, 128  ;;  %s2270_s25 = smov [#allocation2]  }
0x16f9   : > { %v1579_v49 = vsub.s32 0, %v1578_v45  ;;  %p2196_p7 = scmp.ne.s32.totalorder %s2721_s18, %s2195_s17  ;;  %s2199_s2 = sshll.u32 %s2270_s25, 4  ;;  %s2200_s2 = int_to_ptr.vmem [resolvable:$false] %s2199_s2 }
0x16fa   : > { %s2201_s4 = scalar_lea.vmem %s2200_s2, 256  ;;  %p2202_p10 = scmp.lt.s32.totalorder %s2721_s18, %s2200_s2 }
0x16fb   : > { %p2197_p8 = pnand %p2196_p7, %p2376_p5  ;;  %p2203_p11 = scmp.lt.s32.totalorder %s2201_s4, %s2195_s17 }
0x16fd   : > { %p2198_p9 = pneg %p2197_p8  ;;  %p2204_p12 = por %p2203_p11, %p2202_p10 }
0x16ff   : > { %p2205_p13 = pnand %p2204_p12, %p2198_p9 }
0x179c   : > { %v1571_v47 = vpop.f32.mrb[8].mxu0 }
0x179d   : > { %v1572_v48 = vadd.f32 %v1571_v47, %v1500_v46  ;;  %v1967_v50 = vpop.f32.mrb[9].mxu0 }
0x179f   : > { %v1576_v51 = vmul.f32 0.3, %v1572_v48 }
0x17a1   : > { %v1580_v52 = vrot.slane %v1576_v51, %v1579_v49 }
0x17a3   : > { %v1581_v54 = vadd.f32 %v1580_v52, %v1575_v53 }
0x17a5   : > { %1582 = vst.msk [vmem:[%s2461_s26] sm:$0xff] %vm528_vm3, %v1581_v54 }
0x17a6   : > { %2208 = shalt.err (!%p2205_p13)
}
0x17a7   : > { %s2209_s28 = scalar_lea.hbm %s2719_s1, 128  ;;  %s2213_s29 = scalar_lea.hbm %s2776_s10, 256 }
0x17a8   : > { %p2210_p0 = scmp.ne.s32.totalorder %s2719_s1, %s2209_s28  ;;  %p2214_p3 = scmp.lt.u32.totalorder %s2719_s1, %s2776_s10 }
0x17a9   : > { %p2215_p4 = scmp.lt.u32.totalorder %s2213_s29, %s2209_s28  ;;  %p2217_p8 = scmp.lt.u32.totalorder %s2209_s28, %s2719_s1 }
0x17aa   : > { %p2211_p1 = pnand %p2210_p0, %p2376_p5 }
0x17ab   : > { %p2216_p7 = por %p2215_p4, %p2214_p3 }
0x17ac   : > { %p2212_p2 = pneg %p2211_p1 }
0x17ad   : > { %p2218_p9 = por %p2217_p8, %p2216_p7 }
0x17af   : > { %p2219_p10 = pnand %p2218_p9, %p2212_p2 }
0x17b1   : > { %2222 = shalt.err (!%p2219_p10)
}
0x17b2   : > { %2037 = dma.vmem_to_hbm [thread:$0]  (%p2376_p5), %s2721_s18, 128, %s2719_s1, %s1587_s19  }
0x17b3 PF: > { %p2053_p11 = scmp.ge.s32.totalorder %s2261_s24, 2  ;;  %s1646_s20 = sand.u32 1, %s2249_s21  }
0x17b4   : > { %s1647_s3 = scalar_lea.sflag [#allocation3], %s1646_s20 }
0x17b5   : > { %p2044_p12 = pnand %p2053_p11, %p2380_p6 }
0x17b7   : > { %2240 = dma.done.wait (!%p2044_p12), %s1647_s3, 128  }
0x17b8   : > { %2242 = vsyncadd (!%p2044_p12), %s1647_s3, 4294967168  ;;  %s2798_s0 = sadd.s32 4294967294, %s2261_s24  }
0x17b9   : > { %s1655_s17 = sand.u32 1, %s2798_s0  }
0x17ba   : > { %s1656_s25 = scalar_lea.sflag [#allocation5], %s1655_s17 }
0x17bb   : > { %2244 = dma.done.wait (!%p2044_p12), %s1656_s25, 32  }
0x17bc   : > { %2246 = vsyncadd (!%p2044_p12), %s1656_s25, 4294967264  ;;  %p26_p5 = scmp.ge.s32.totalorder %s2361_s27, 4   ;;  %s2799_s21 = smov %s2253_s22 }
0x17bd   : > { %s2800_s22 = smov %s2257_s23  ;;  %s2801_s23 = smov %s2374_s30 }
0x17be   : > { %s2802_s24 = smov %s2361_s27  ;;  %28 = sbr.rel (!%p26_p5) target bundleno = 12 (0xc), region = 130 }
0x17c5   :  { %1668 = vsyncpa [#allocation3], 1 }
0x17c6   :  { %1670 = vsyncpa [#allocation3 + $0x1], 1 }
0x17c7   :  { %1671 = vsyncpa [#allocation5], 1 }
0x17c8   :  { %1673 = vsyncpa [#allocation5 + $0x1], 1 }

</bundles_post_ra>
